<compile_context>
chip_gen: v7x
topology: tpu7x:2x2x1
jax: 0.10.0
libtpu: 0.0.40
codegen_flags: <defaults>
</compile_context>

<pallas_src>
import functools

import jax
import jax.numpy as jnp
import numpy as np
from jax import lax
from jax.experimental import pallas as pl
from jax.experimental.pallas import tpu as pltpu

B1, B2, EPS = 0.9, 0.999, 1e-8   # torch.optim.Adam defaults
SEQ_LEN = 150                    # hard-coded in Learner.forward

# dot_general dimension numbers (avoid materializing transposes in backward).
_NN = (((1,), (0,)), ((), ()))   # [B,K] . [K,N]            -> [B,N]
_NT = (((1,), (1,)), ((), ()))   # [B,K] . [N,K]^T          -> [B,N]  (rhs transposed)
_TN = (((0,), (0,)), ((), ()))   # [B,K]^T . [B,N]          -> [K,N]  (lhs transposed)


def _bf(a):
    return a.astype(jnp.bfloat16)


def _dot(a_bf, b_bf, dims):
    """Single-pass bf16 MXU matmul with f32 accumulation (operands pre-cast)."""
    return lax.dot_general(a_bf, b_bf, dimension_numbers=dims,
                           preferred_element_type=jnp.float32)


def _net_grads(x_bf, w1, b1, w2, b2, *, want_loss):
    """Inner-net forward + manual backward.

    Returns ((1,1) loss or None, (gw1, gb1, gw2, gb2)).
    net: y = tanh(x @ w1 + b1) @ w2 + b2 ;  loss = mean(y**2).
    """
    B, O = x_bf.shape[0], w2.shape[1]
    w1_bf, w2_bf = _bf(w1), _bf(w2)

    h_pre = _dot(x_bf, w1_bf, _NN) + b1
    h = jnp.tanh(h_pre)
    h_bf = _bf(h)
    y = _dot(h_bf, w2_bf, _NN) + b2

    dy = (2.0 / (B * O)) * y                       # dL/dy
    dy_bf = _bf(dy)
    gw2 = _dot(h_bf, dy_bf, _TN)                   # [H,O] = sum_b h * dy
    gb2 = jnp.sum(dy, axis=0, keepdims=True)
    dh = _dot(dy_bf, w2_bf, _NT)                   # [B,H] = dy . w2^T
    dh_pre = dh * (1.0 - h * h)                    # tanh'
    gw1 = _dot(x_bf, _bf(dh_pre), _TN)             # [D,H] = sum_b x * dh_pre
    gb1 = jnp.sum(dh_pre, axis=0, keepdims=True)

    loss = None
    if want_loss:
        loss = jnp.sum(jnp.sum(y * y, axis=1, keepdims=True),
                       axis=0, keepdims=True) * (1.0 / (B * O))   # (1, 1)
    return loss, (gw1, gb1, gw2, gb2)


def _adapt(x_bf, theta, num_updates, lr):
    """num_updates unrolled Adam steps on theta using grads wrt support_x."""
    m = [jnp.zeros_like(p) for p in theta]
    v = [jnp.zeros_like(p) for p in theta]
    for t in range(1, num_updates + 1):
        _, grads = _net_grads(x_bf, *theta, want_loss=False)
        c1 = lr / (1.0 - B1 ** t)          # lr / bias_correction1   (Python float)
        inv_bc2 = 1.0 / (1.0 - B2 ** t)    # 1 / bias_correction2    (Python float)
        new_theta = []
        for j, g in enumerate(grads):
            m[j] = B1 * m[j] + (1.0 - B1) * g
            v[j] = B2 * v[j] + (1.0 - B2) * (g * g)
            new_theta.append(theta[j] - c1 * m[j]
                             / (jnp.sqrt(v[j] * inv_bc2) + EPS))
        theta = new_theta
    return theta


def _learner_kernel(sx_ref, qx_ref, w1_ref, b1_ref, w2_ref, b2_ref,      # inputs
                    loss_ref, gw1_ref, gb1_ref, gw2_ref, gb2_ref,        # outputs
                    *, num_updates, lr):
    # copy_theta(): learner params <- meta params (carried as values; loaded once)
    x_bf = _bf(sx_ref[...])
    theta = [w1_ref[...], b1_ref[...], w2_ref[...], b2_ref[...]]

    # Inner adaptation loop (fully unrolled Adam steps).
    theta = _adapt(x_bf, theta, num_updates, lr)

    # Query pass with adapted parameters + grads_pi (autograd.grad equivalent).
    loss_q, (gw1, gb1, gw2, gb2) = _net_grads(_bf(qx_ref[...]), *theta,
                                              want_loss=True)
    loss_ref[...] = loss_q
    gw1_ref[...] = gw1
    gb1_ref[...] = gb1
    gw2_ref[...] = gw2
    gb2_ref[...] = gb2


def learner_forward(support_x, query_x, params, num_updates, lr):
    w1, b1, w2, b2 = params
    D, H = w1.shape
    O = w2.shape[1]
    vmem = pl.BlockSpec(memory_space=pltpu.MemorySpace.VMEM)

    out_shapes = (
        jax.ShapeDtypeStruct((1, 1), jnp.float32),   # query loss
        jax.ShapeDtypeStruct((D, H), jnp.float32),   # d loss / d W1
        jax.ShapeDtypeStruct((1, H), jnp.float32),   # d loss / d b1
        jax.ShapeDtypeStruct((H, O), jnp.float32),   # d loss / d W2
        jax.ShapeDtypeStruct((1, O), jnp.float32),   # d loss / d b2
    )

    kern = functools.partial(_learner_kernel,
                             num_updates=int(num_updates), lr=float(lr))
    loss, gw1, gb1, gw2, gb2 = pl.pallas_call(
        kern,
        out_shape=out_shapes,
        in_specs=[vmem] * 6,
        out_specs=(vmem,) * 5,
        # No grid / scratch: whole working set (< 100 KiB) stays resident in VMEM.
    )(support_x, query_x, w1, b1, w2, b2)

    grads_pi = (gw1, gb1, gw2, gb2)
    return loss[0, 0], grads_pi, loss[0, 0] / SEQ_LEN


def learner_forward_ref(support_x, query_x, params, num_updates, lr):
    """Pure-JAX reference sharing the exact same math helpers."""
    theta = [p.astype(jnp.float32) for p in params]
    theta = _adapt(_bf(support_x), theta, num_updates, lr)
    loss, grads = _net_grads(_bf(query_x), *theta, want_loss=True)
    return loss[0, 0], grads, loss[0, 0] / SEQ_LEN


if __name__ == "__main__":
    key = jax.random.PRNGKey(0)
    B, D, H, O = 8, 32, 32, 8          # small shapes: batch=8, feat=32, hidden=32
    num_updates, lr = 3, 1e-2

    ks = jax.random.split(key, 4)
    support_x = jax.random.normal(ks[0], (B, D), jnp.float32)
    query_x = jax.random.normal(ks[1], (B, D), jnp.float32)
    w1 = 0.1 * jax.random.normal(ks[2], (D, H), jnp.float32)
    b1 = jnp.zeros((1, H), jnp.float32)
    w2 = 0.1 * jax.random.normal(ks[3], (H, O), jnp.float32)
    b2 = jnp.zeros((1, O), jnp.float32)
    params = (w1, b1, w2, b2)

    loss, grads, scaled = learner_forward(support_x, query_x, params, num_updates, lr)
    jax.block_until_ready((loss, grads, scaled))

    loss_r, grads_r, scaled_r = learner_forward_ref(
        support_x, query_x, params, num_updates, lr)

    ok = bool(np.isfinite(np.asarray(loss)))
    ok = ok and np.allclose(np.asarray(loss), np.asarray(loss_r), rtol=2e-3, atol=2e-5)
    for g, gr in zip(grads, grads_r):
        ok = ok and np.allclose(np.asarray(g), np.asarray(gr), rtol=2e-3, atol=2e-5)
    ok = ok and np.allclose(np.asarray(scaled), np.asarray(scaled_r), rtol=2e-3, atol=2e-5)
    if not ok:
        raise SystemExit("mismatch vs pure-JAX reference")
    print("KERNEL_OK")
</pallas_src>

<mosaic_0001>
module attributes {stable_mosaic.version = 11 : i64} {
  func.func @_learner_kernel(%arg0: memref<8x32xf32, #tpu.memory_space<vmem>>, %arg1: memref<8x32xf32, #tpu.memory_space<vmem>>, %arg2: memref<32x32xf32, #tpu.memory_space<vmem>>, %arg3: memref<1x32xf32, #tpu.memory_space<vmem>>, %arg4: memref<32x8xf32, #tpu.memory_space<vmem>>, %arg5: memref<1x8xf32, #tpu.memory_space<vmem>>, %arg6: memref<1x1xf32, #tpu.memory_space<vmem>>, %arg7: memref<32x32xf32, #tpu.memory_space<vmem>>, %arg8: memref<1x32xf32, #tpu.memory_space<vmem>>, %arg9: memref<32x8xf32, #tpu.memory_space<vmem>>, %arg10: memref<1x8xf32, #tpu.memory_space<vmem>>) attributes {dimension_semantics = [], scalar_prefetch = 0 : i64, scratch_operands = 0 : i64, tpu.core_type = #tpu.core_type<tc>} {
    %c0 = arith.constant 0 : index
    %c0_0 = arith.constant 0 : index
    %0 = vector.load %arg0[%c0, %c0_0] : memref<8x32xf32, #tpu.memory_space<vmem>>, vector<8x32xf32>
    %1 = arith.truncf %0 : vector<8x32xf32> to vector<8x32xbf16>
    %c0_1 = arith.constant 0 : index
    %c0_2 = arith.constant 0 : index
    %2 = vector.load %arg2[%c0_1, %c0_2] : memref<32x32xf32, #tpu.memory_space<vmem>>, vector<32x32xf32>
    %c0_3 = arith.constant 0 : index
    %c0_4 = arith.constant 0 : index
    %3 = vector.load %arg3[%c0_3, %c0_4] : memref<1x32xf32, #tpu.memory_space<vmem>>, vector<1x32xf32>
    %c0_5 = arith.constant 0 : index
    %c0_6 = arith.constant 0 : index
    %4 = vector.load %arg4[%c0_5, %c0_6] : memref<32x8xf32, #tpu.memory_space<vmem>>, vector<32x8xf32>
    %c0_7 = arith.constant 0 : index
    %c0_8 = arith.constant 0 : index
    %5 = vector.load %arg5[%c0_7, %c0_8] : memref<1x8xf32, #tpu.memory_space<vmem>>, vector<1x8xf32>
    %cst = arith.constant 0.000000e+00 : f32
    %6 = vector.broadcast %cst : f32 to vector<32x32xf32>
    %cst_9 = arith.constant 0.000000e+00 : f32
    %7 = vector.broadcast %cst_9 : f32 to vector<1x32xf32>
    %cst_10 = arith.constant 0.000000e+00 : f32
    %8 = vector.broadcast %cst_10 : f32 to vector<32x8xf32>
    %cst_11 = arith.constant 0.000000e+00 : f32
    %9 = vector.broadcast %cst_11 : f32 to vector<1x8xf32>
    %cst_12 = arith.constant 0.000000e+00 : f32
    %10 = vector.broadcast %cst_12 : f32 to vector<32x32xf32>
    %cst_13 = arith.constant 0.000000e+00 : f32
    %11 = vector.broadcast %cst_13 : f32 to vector<1x32xf32>
    %cst_14 = arith.constant 0.000000e+00 : f32
    %12 = vector.broadcast %cst_14 : f32 to vector<32x8xf32>
    %cst_15 = arith.constant 0.000000e+00 : f32
    %13 = vector.broadcast %cst_15 : f32 to vector<1x8xf32>
    %14 = arith.truncf %2 : vector<32x32xf32> to vector<32x32xbf16>
    %15 = arith.truncf %4 : vector<32x8xf32> to vector<32x8xbf16>
    %cst_16 = arith.constant dense<0.000000e+00> : vector<8x32xf32>
    %16 = tpu.matmul %1, %14, %cst_16 {dimension_numbers = #tpu.dot_dimension_numbers<[1], [0], [0], [1], [0, 0, 1, 1], [], []>} : vector<8x32xbf16>, vector<32x32xbf16>, vector<8x32xf32> -> vector<8x32xf32>
    %17 = vector.broadcast %3 : vector<1x32xf32> to vector<8x32xf32>
    %18 = arith.addf %16, %17 : vector<8x32xf32>
    %19 = math.tanh %18 : vector<8x32xf32>
    %20 = arith.truncf %19 : vector<8x32xf32> to vector<8x32xbf16>
    %cst_17 = arith.constant dense<0.000000e+00> : vector<8x8xf32>
    %21 = tpu.matmul %20, %15, %cst_17 {dimension_numbers = #tpu.dot_dimension_numbers<[1], [0], [0], [1], [0, 0, 1, 1], [], []>} : vector<8x32xbf16>, vector<32x8xbf16>, vector<8x8xf32> -> vector<8x8xf32>
    %22 = vector.broadcast %5 : vector<1x8xf32> to vector<8x8xf32>
    %23 = arith.addf %21, %22 : vector<8x8xf32>
    %cst_18 = arith.constant 3.125000e-02 : f32
    %24 = vector.broadcast %cst_18 : f32 to vector<8x8xf32>
    %25 = arith.mulf %24, %23 : vector<8x8xf32>
    %26 = arith.truncf %25 : vector<8x8xf32> to vector<8x8xbf16>
    %cst_19 = arith.constant dense<0.000000e+00> : vector<32x8xf32>
    %27 = tpu.matmul %20, %26, %cst_19 {dimension_numbers = #tpu.dot_dimension_numbers<[0], [0], [1], [1], [0, 1, 1, 1], [], []>} : vector<8x32xbf16>, vector<8x8xbf16>, vector<32x8xf32> -> vector<32x8xf32>
    %cst_20 = arith.constant dense<0.000000e+00> : vector<8xf32>
    %28 = vector.multi_reduction <add>, %25, %cst_20 [0] : vector<8x8xf32> to vector<8xf32>
    %29 = vector.shape_cast %28 : vector<8xf32> to vector<1x8xf32>
    %cst_21 = arith.constant dense<0.000000e+00> : vector<8x32xf32>
    %30 = tpu.matmul %26, %15, %cst_21 {dimension_numbers = #tpu.dot_dimension_numbers<[1], [1], [0], [0], [0, 0, 1, 0], [], []>} : vector<8x8xbf16>, vector<32x8xbf16>, vector<8x32xf32> -> vector<8x32xf32>
    %31 = arith.mulf %19, %19 : vector<8x32xf32>
    %cst_22 = arith.constant 1.000000e+00 : f32
    %32 = vector.broadcast %cst_22 : f32 to vector<8x32xf32>
    %33 = arith.subf %32, %31 : vector<8x32xf32>
    %34 = arith.mulf %30, %33 : vector<8x32xf32>
    %35 = arith.truncf %34 : vector<8x32xf32> to vector<8x32xbf16>
    %cst_23 = arith.constant dense<0.000000e+00> : vector<32x32xf32>
    %36 = tpu.matmul %1, %35, %cst_23 {dimension_numbers = #tpu.dot_dimension_numbers<[0], [0], [1], [1], [0, 1, 1, 1], [], []>} : vector<8x32xbf16>, vector<8x32xbf16>, vector<32x32xf32> -> vector<32x32xf32>
    %cst_24 = arith.constant dense<0.000000e+00> : vector<32xf32>
    %37 = vector.multi_reduction <add>, %34, %cst_24 [0] : vector<8x32xf32> to vector<32xf32>
    %38 = vector.shape_cast %37 : vector<32xf32> to vector<1x32xf32>
    %cst_25 = arith.constant 0.899999976 : f32
    %39 = vector.broadcast %cst_25 : f32 to vector<32x32xf32>
    %40 = arith.mulf %39, %6 : vector<32x32xf32>
    %cst_26 = arith.constant 1.000000e-01 : f32
    %41 = vector.broadcast %cst_26 : f32 to vector<32x32xf32>
    %42 = arith.mulf %41, %36 : vector<32x32xf32>
    %43 = arith.addf %40, %42 : vector<32x32xf32>
    %cst_27 = arith.constant 9.990000e-01 : f32
    %44 = vector.broadcast %cst_27 : f32 to vector<32x32xf32>
    %45 = arith.mulf %44, %10 : vector<32x32xf32>
    %46 = arith.mulf %36, %36 : vector<32x32xf32>
    %cst_28 = arith.constant 1.000000e-03 : f32
    %47 = vector.broadcast %cst_28 : f32 to vector<32x32xf32>
    %48 = arith.mulf %47, %46 : vector<32x32xf32>
    %49 = arith.addf %45, %48 : vector<32x32xf32>
    %cst_29 = arith.constant 1.000000e-01 : f32
    %50 = vector.broadcast %cst_29 : f32 to vector<32x32xf32>
    %51 = arith.mulf %50, %43 : vector<32x32xf32>
    %cst_30 = arith.constant 1.000000e+03 : f32
    %52 = vector.broadcast %cst_30 : f32 to vector<32x32xf32>
    %53 = arith.mulf %49, %52 : vector<32x32xf32>
    %54 = math.sqrt %53 : vector<32x32xf32>
    %cst_31 = arith.constant 9.99999993E-9 : f32
    %55 = vector.broadcast %cst_31 : f32 to vector<32x32xf32>
    %56 = arith.addf %54, %55 : vector<32x32xf32>
    %57 = arith.divf %51, %56 : vector<32x32xf32>
    %58 = arith.subf %2, %57 : vector<32x32xf32>
    %cst_32 = arith.constant 0.899999976 : f32
    %59 = vector.broadcast %cst_32 : f32 to vector<1x32xf32>
    %60 = arith.mulf %59, %7 : vector<1x32xf32>
    %cst_33 = arith.constant 1.000000e-01 : f32
    %61 = vector.broadcast %cst_33 : f32 to vector<1x32xf32>
    %62 = arith.mulf %61, %38 : vector<1x32xf32>
    %63 = arith.addf %60, %62 : vector<1x32xf32>
    %cst_34 = arith.constant 9.990000e-01 : f32
    %64 = vector.broadcast %cst_34 : f32 to vector<1x32xf32>
    %65 = arith.mulf %64, %11 : vector<1x32xf32>
    %66 = arith.mulf %38, %38 : vector<1x32xf32>
    %cst_35 = arith.constant 1.000000e-03 : f32
    %67 = vector.broadcast %cst_35 : f32 to vector<1x32xf32>
    %68 = arith.mulf %67, %66 : vector<1x32xf32>
    %69 = arith.addf %65, %68 : vector<1x32xf32>
    %cst_36 = arith.constant 1.000000e-01 : f32
    %70 = vector.broadcast %cst_36 : f32 to vector<1x32xf32>
    %71 = arith.mulf %70, %63 : vector<1x32xf32>
    %cst_37 = arith.constant 1.000000e+03 : f32
    %72 = vector.broadcast %cst_37 : f32 to vector<1x32xf32>
    %73 = arith.mulf %69, %72 : vector<1x32xf32>
    %74 = math.sqrt %73 : vector<1x32xf32>
    %cst_38 = arith.constant 9.99999993E-9 : f32
    %75 = vector.broadcast %cst_38 : f32 to vector<1x32xf32>
    %76 = arith.addf %74, %75 : vector<1x32xf32>
    %77 = arith.divf %71, %76 : vector<1x32xf32>
    %78 = arith.subf %3, %77 : vector<1x32xf32>
    %cst_39 = arith.constant 0.899999976 : f32
    %79 = vector.broadcast %cst_39 : f32 to vector<32x8xf32>
    %80 = arith.mulf %79, %8 : vector<32x8xf32>
    %cst_40 = arith.constant 1.000000e-01 : f32
    %81 = vector.broadcast %cst_40 : f32 to vector<32x8xf32>
    %82 = arith.mulf %81, %27 : vector<32x8xf32>
    %83 = arith.addf %80, %82 : vector<32x8xf32>
    %cst_41 = arith.constant 9.990000e-01 : f32
    %84 = vector.broadcast %cst_41 : f32 to vector<32x8xf32>
    %85 = arith.mulf %84, %12 : vector<32x8xf32>
    %86 = arith.mulf %27, %27 : vector<32x8xf32>
    %cst_42 = arith.constant 1.000000e-03 : f32
    %87 = vector.broadcast %cst_42 : f32 to vector<32x8xf32>
    %88 = arith.mulf %87, %86 : vector<32x8xf32>
    %89 = arith.addf %85, %88 : vector<32x8xf32>
    %cst_43 = arith.constant 1.000000e-01 : f32
    %90 = vector.broadcast %cst_43 : f32 to vector<32x8xf32>
    %91 = arith.mulf %90, %83 : vector<32x8xf32>
    %cst_44 = arith.constant 1.000000e+03 : f32
    %92 = vector.broadcast %cst_44 : f32 to vector<32x8xf32>
    %93 = arith.mulf %89, %92 : vector<32x8xf32>
    %94 = math.sqrt %93 : vector<32x8xf32>
    %cst_45 = arith.constant 9.99999993E-9 : f32
    %95 = vector.broadcast %cst_45 : f32 to vector<32x8xf32>
    %96 = arith.addf %94, %95 : vector<32x8xf32>
    %97 = arith.divf %91, %96 : vector<32x8xf32>
    %98 = arith.subf %4, %97 : vector<32x8xf32>
    %cst_46 = arith.constant 0.899999976 : f32
    %99 = vector.broadcast %cst_46 : f32 to vector<1x8xf32>
    %100 = arith.mulf %99, %9 : vector<1x8xf32>
    %cst_47 = arith.constant 1.000000e-01 : f32
    %101 = vector.broadcast %cst_47 : f32 to vector<1x8xf32>
    %102 = arith.mulf %101, %29 : vector<1x8xf32>
    %103 = arith.addf %100, %102 : vector<1x8xf32>
    %cst_48 = arith.constant 9.990000e-01 : f32
    %104 = vector.broadcast %cst_48 : f32 to vector<1x8xf32>
    %105 = arith.mulf %104, %13 : vector<1x8xf32>
    %106 = arith.mulf %29, %29 : vector<1x8xf32>
    %cst_49 = arith.constant 1.000000e-03 : f32
    %107 = vector.broadcast %cst_49 : f32 to vector<1x8xf32>
    %108 = arith.mulf %107, %106 : vector<1x8xf32>
    %109 = arith.addf %105, %108 : vector<1x8xf32>
    %cst_50 = arith.constant 1.000000e-01 : f32
    %110 = vector.broadcast %cst_50 : f32 to vector<1x8xf32>
    %111 = arith.mulf %110, %103 : vector<1x8xf32>
    %cst_51 = arith.constant 1.000000e+03 : f32
    %112 = vector.broadcast %cst_51 : f32 to vector<1x8xf32>
    %113 = arith.mulf %109, %112 : vector<1x8xf32>
    %114 = math.sqrt %113 : vector<1x8xf32>
    %cst_52 = arith.constant 9.99999993E-9 : f32
    %115 = vector.broadcast %cst_52 : f32 to vector<1x8xf32>
    %116 = arith.addf %114, %115 : vector<1x8xf32>
    %117 = arith.divf %111, %116 : vector<1x8xf32>
    %118 = arith.subf %5, %117 : vector<1x8xf32>
    %119 = arith.truncf %58 : vector<32x32xf32> to vector<32x32xbf16>
    %120 = arith.truncf %98 : vector<32x8xf32> to vector<32x8xbf16>
    %cst_53 = arith.constant dense<0.000000e+00> : vector<8x32xf32>
    %121 = tpu.matmul %1, %119, %cst_53 {dimension_numbers = #tpu.dot_dimension_numbers<[1], [0], [0], [1], [0, 0, 1, 1], [], []>} : vector<8x32xbf16>, vector<32x32xbf16>, vector<8x32xf32> -> vector<8x32xf32>
    %122 = vector.broadcast %78 : vector<1x32xf32> to vector<8x32xf32>
    %123 = arith.addf %121, %122 : vector<8x32xf32>
    %124 = math.tanh %123 : vector<8x32xf32>
    %125 = arith.truncf %124 : vector<8x32xf32> to vector<8x32xbf16>
    %cst_54 = arith.constant dense<0.000000e+00> : vector<8x8xf32>
    %126 = tpu.matmul %125, %120, %cst_54 {dimension_numbers = #tpu.dot_dimension_numbers<[1], [0], [0], [1], [0, 0, 1, 1], [], []>} : vector<8x32xbf16>, vector<32x8xbf16>, vector<8x8xf32> -> vector<8x8xf32>
    %127 = vector.broadcast %118 : vector<1x8xf32> to vector<8x8xf32>
    %128 = arith.addf %126, %127 : vector<8x8xf32>
    %cst_55 = arith.constant 3.125000e-02 : f32
    %129 = vector.broadcast %cst_55 : f32 to vector<8x8xf32>
    %130 = arith.mulf %129, %128 : vector<8x8xf32>
    %131 = arith.truncf %130 : vector<8x8xf32> to vector<8x8xbf16>
    %cst_56 = arith.constant dense<0.000000e+00> : vector<32x8xf32>
    %132 = tpu.matmul %125, %131, %cst_56 {dimension_numbers = #tpu.dot_dimension_numbers<[0], [0], [1], [1], [0, 1, 1, 1], [], []>} : vector<8x32xbf16>, vector<8x8xbf16>, vector<32x8xf32> -> vector<32x8xf32>
    %cst_57 = arith.constant dense<0.000000e+00> : vector<8xf32>
    %133 = vector.multi_reduction <add>, %130, %cst_57 [0] : vector<8x8xf32> to vector<8xf32>
    %134 = vector.shape_cast %133 : vector<8xf32> to vector<1x8xf32>
    %cst_58 = arith.constant dense<0.000000e+00> : vector<8x32xf32>
    %135 = tpu.matmul %131, %120, %cst_58 {dimension_numbers = #tpu.dot_dimension_numbers<[1], [1], [0], [0], [0, 0, 1, 0], [], []>} : vector<8x8xbf16>, vector<32x8xbf16>, vector<8x32xf32> -> vector<8x32xf32>
    %136 = arith.mulf %124, %124 : vector<8x32xf32>
    %cst_59 = arith.constant 1.000000e+00 : f32
    %137 = vector.broadcast %cst_59 : f32 to vector<8x32xf32>
    %138 = arith.subf %137, %136 : vector<8x32xf32>
    %139 = arith.mulf %135, %138 : vector<8x32xf32>
    %140 = arith.truncf %139 : vector<8x32xf32> to vector<8x32xbf16>
    %cst_60 = arith.constant dense<0.000000e+00> : vector<32x32xf32>
    %141 = tpu.matmul %1, %140, %cst_60 {dimension_numbers = #tpu.dot_dimension_numbers<[0], [0], [1], [1], [0, 1, 1, 1], [], []>} : vector<8x32xbf16>, vector<8x32xbf16>, vector<32x32xf32> -> vector<32x32xf32>
    %cst_61 = arith.constant dense<0.000000e+00> : vector<32xf32>
    %142 = vector.multi_reduction <add>, %139, %cst_61 [0] : vector<8x32xf32> to vector<32xf32>
    %143 = vector.shape_cast %142 : vector<32xf32> to vector<1x32xf32>
    %cst_62 = arith.constant 0.899999976 : f32
    %144 = vector.broadcast %cst_62 : f32 to vector<32x32xf32>
    %145 = arith.mulf %144, %43 : vector<32x32xf32>
    %cst_63 = arith.constant 1.000000e-01 : f32
    %146 = vector.broadcast %cst_63 : f32 to vector<32x32xf32>
    %147 = arith.mulf %146, %141 : vector<32x32xf32>
    %148 = arith.addf %145, %147 : vector<32x32xf32>
    %cst_64 = arith.constant 9.990000e-01 : f32
    %149 = vector.broadcast %cst_64 : f32 to vector<32x32xf32>
    %150 = arith.mulf %149, %49 : vector<32x32xf32>
    %151 = arith.mulf %141, %141 : vector<32x32xf32>
    %cst_65 = arith.constant 1.000000e-03 : f32
    %152 = vector.broadcast %cst_65 : f32 to vector<32x32xf32>
    %153 = arith.mulf %152, %151 : vector<32x32xf32>
    %154 = arith.addf %150, %153 : vector<32x32xf32>
    %cst_66 = arith.constant 0.0526315793 : f32
    %155 = vector.broadcast %cst_66 : f32 to vector<32x32xf32>
    %156 = arith.mulf %155, %148 : vector<32x32xf32>
    %cst_67 = arith.constant 500.250122 : f32
    %157 = vector.broadcast %cst_67 : f32 to vector<32x32xf32>
    %158 = arith.mulf %154, %157 : vector<32x32xf32>
    %159 = math.sqrt %158 : vector<32x32xf32>
    %cst_68 = arith.constant 9.99999993E-9 : f32
    %160 = vector.broadcast %cst_68 : f32 to vector<32x32xf32>
    %161 = arith.addf %159, %160 : vector<32x32xf32>
    %162 = arith.divf %156, %161 : vector<32x32xf32>
    %163 = arith.subf %58, %162 : vector<32x32xf32>
    %cst_69 = arith.constant 0.899999976 : f32
    %164 = vector.broadcast %cst_69 : f32 to vector<1x32xf32>
    %165 = arith.mulf %164, %63 : vector<1x32xf32>
    %cst_70 = arith.constant 1.000000e-01 : f32
    %166 = vector.broadcast %cst_70 : f32 to vector<1x32xf32>
    %167 = arith.mulf %166, %143 : vector<1x32xf32>
    %168 = arith.addf %165, %167 : vector<1x32xf32>
    %cst_71 = arith.constant 9.990000e-01 : f32
    %169 = vector.broadcast %cst_71 : f32 to vector<1x32xf32>
    %170 = arith.mulf %169, %69 : vector<1x32xf32>
    %171 = arith.mulf %143, %143 : vector<1x32xf32>
    %cst_72 = arith.constant 1.000000e-03 : f32
    %172 = vector.broadcast %cst_72 : f32 to vector<1x32xf32>
    %173 = arith.mulf %172, %171 : vector<1x32xf32>
    %174 = arith.addf %170, %173 : vector<1x32xf32>
    %cst_73 = arith.constant 0.0526315793 : f32
    %175 = vector.broadcast %cst_73 : f32 to vector<1x32xf32>
    %176 = arith.mulf %175, %168 : vector<1x32xf32>
    %cst_74 = arith.constant 500.250122 : f32
    %177 = vector.broadcast %cst_74 : f32 to vector<1x32xf32>
    %178 = arith.mulf %174, %177 : vector<1x32xf32>
    %179 = math.sqrt %178 : vector<1x32xf32>
    %cst_75 = arith.constant 9.99999993E-9 : f32
    %180 = vector.broadcast %cst_75 : f32 to vector<1x32xf32>
    %181 = arith.addf %179, %180 : vector<1x32xf32>
    %182 = arith.divf %176, %181 : vector<1x32xf32>
    %183 = arith.subf %78, %182 : vector<1x32xf32>
    %cst_76 = arith.constant 0.899999976 : f32
    %184 = vector.broadcast %cst_76 : f32 to vector<32x8xf32>
    %185 = arith.mulf %184, %83 : vector<32x8xf32>
    %cst_77 = arith.constant 1.000000e-01 : f32
    %186 = vector.broadcast %cst_77 : f32 to vector<32x8xf32>
    %187 = arith.mulf %186, %132 : vector<32x8xf32>
    %188 = arith.addf %185, %187 : vector<32x8xf32>
    %cst_78 = arith.constant 9.990000e-01 : f32
    %189 = vector.broadcast %cst_78 : f32 to vector<32x8xf32>
    %190 = arith.mulf %189, %89 : vector<32x8xf32>
    %191 = arith.mulf %132, %132 : vector<32x8xf32>
    %cst_79 = arith.constant 1.000000e-03 : f32
    %192 = vector.broadcast %cst_79 : f32 to vector<32x8xf32>
    %193 = arith.mulf %192, %191 : vector<32x8xf32>
    %194 = arith.addf %190, %193 : vector<32x8xf32>
    %cst_80 = arith.constant 0.0526315793 : f32
    %195 = vector.broadcast %cst_80 : f32 to vector<32x8xf32>
    %196 = arith.mulf %195, %188 : vector<32x8xf32>
    %cst_81 = arith.constant 500.250122 : f32
    %197 = vector.broadcast %cst_81 : f32 to vector<32x8xf32>
    %198 = arith.mulf %194, %197 : vector<32x8xf32>
    %199 = math.sqrt %198 : vector<32x8xf32>
    %cst_82 = arith.constant 9.99999993E-9 : f32
    %200 = vector.broadcast %cst_82 : f32 to vector<32x8xf32>
    %201 = arith.addf %199, %200 : vector<32x8xf32>
    %202 = arith.divf %196, %201 : vector<32x8xf32>
    %203 = arith.subf %98, %202 : vector<32x8xf32>
    %cst_83 = arith.constant 0.899999976 : f32
    %204 = vector.broadcast %cst_83 : f32 to vector<1x8xf32>
    %205 = arith.mulf %204, %103 : vector<1x8xf32>
    %cst_84 = arith.constant 1.000000e-01 : f32
    %206 = vector.broadcast %cst_84 : f32 to vector<1x8xf32>
    %207 = arith.mulf %206, %134 : vector<1x8xf32>
    %208 = arith.addf %205, %207 : vector<1x8xf32>
    %cst_85 = arith.constant 9.990000e-01 : f32
    %209 = vector.broadcast %cst_85 : f32 to vector<1x8xf32>
    %210 = arith.mulf %209, %109 : vector<1x8xf32>
    %211 = arith.mulf %134, %134 : vector<1x8xf32>
    %cst_86 = arith.constant 1.000000e-03 : f32
    %212 = vector.broadcast %cst_86 : f32 to vector<1x8xf32>
    %213 = arith.mulf %212, %211 : vector<1x8xf32>
    %214 = arith.addf %210, %213 : vector<1x8xf32>
    %cst_87 = arith.constant 0.0526315793 : f32
    %215 = vector.broadcast %cst_87 : f32 to vector<1x8xf32>
    %216 = arith.mulf %215, %208 : vector<1x8xf32>
    %cst_88 = arith.constant 500.250122 : f32
    %217 = vector.broadcast %cst_88 : f32 to vector<1x8xf32>
    %218 = arith.mulf %214, %217 : vector<1x8xf32>
    %219 = math.sqrt %218 : vector<1x8xf32>
    %cst_89 = arith.constant 9.99999993E-9 : f32
    %220 = vector.broadcast %cst_89 : f32 to vector<1x8xf32>
    %221 = arith.addf %219, %220 : vector<1x8xf32>
    %222 = arith.divf %216, %221 : vector<1x8xf32>
    %223 = arith.subf %118, %222 : vector<1x8xf32>
    %224 = arith.truncf %163 : vector<32x32xf32> to vector<32x32xbf16>
    %225 = arith.truncf %203 : vector<32x8xf32> to vector<32x8xbf16>
    %cst_90 = arith.constant dense<0.000000e+00> : vector<8x32xf32>
    %226 = tpu.matmul %1, %224, %cst_90 {dimension_numbers = #tpu.dot_dimension_numbers<[1], [0], [0], [1], [0, 0, 1, 1], [], []>} : vector<8x32xbf16>, vector<32x32xbf16>, vector<8x32xf32> -> vector<8x32xf32>
    %227 = vector.broadcast %183 : vector<1x32xf32> to vector<8x32xf32>
    %228 = arith.addf %226, %227 : vector<8x32xf32>
    %229 = math.tanh %228 : vector<8x32xf32>
    %230 = arith.truncf %229 : vector<8x32xf32> to vector<8x32xbf16>
    %cst_91 = arith.constant dense<0.000000e+00> : vector<8x8xf32>
    %231 = tpu.matmul %230, %225, %cst_91 {dimension_numbers = #tpu.dot_dimension_numbers<[1], [0], [0], [1], [0, 0, 1, 1], [], []>} : vector<8x32xbf16>, vector<32x8xbf16>, vector<8x8xf32> -> vector<8x8xf32>
    %232 = vector.broadcast %223 : vector<1x8xf32> to vector<8x8xf32>
    %233 = arith.addf %231, %232 : vector<8x8xf32>
    %cst_92 = arith.constant 3.125000e-02 : f32
    %234 = vector.broadcast %cst_92 : f32 to vector<8x8xf32>
    %235 = arith.mulf %234, %233 : vector<8x8xf32>
    %236 = arith.truncf %235 : vector<8x8xf32> to vector<8x8xbf16>
    %cst_93 = arith.constant dense<0.000000e+00> : vector<32x8xf32>
    %237 = tpu.matmul %230, %236, %cst_93 {dimension_numbers = #tpu.dot_dimension_numbers<[0], [0], [1], [1], [0, 1, 1, 1], [], []>} : vector<8x32xbf16>, vector<8x8xbf16>, vector<32x8xf32> -> vector<32x8xf32>
    %cst_94 = arith.constant dense<0.000000e+00> : vector<8xf32>
    %238 = vector.multi_reduction <add>, %235, %cst_94 [0] : vector<8x8xf32> to vector<8xf32>
    %239 = vector.shape_cast %238 : vector<8xf32> to vector<1x8xf32>
    %cst_95 = arith.constant dense<0.000000e+00> : vector<8x32xf32>
    %240 = tpu.matmul %236, %225, %cst_95 {dimension_numbers = #tpu.dot_dimension_numbers<[1], [1], [0], [0], [0, 0, 1, 0], [], []>} : vector<8x8xbf16>, vector<32x8xbf16>, vector<8x32xf32> -> vector<8x32xf32>
    %241 = arith.mulf %229, %229 : vector<8x32xf32>
    %cst_96 = arith.constant 1.000000e+00 : f32
    %242 = vector.broadcast %cst_96 : f32 to vector<8x32xf32>
    %243 = arith.subf %242, %241 : vector<8x32xf32>
    %244 = arith.mulf %240, %243 : vector<8x32xf32>
    %245 = arith.truncf %244 : vector<8x32xf32> to vector<8x32xbf16>
    %cst_97 = arith.constant dense<0.000000e+00> : vector<32x32xf32>
    %246 = tpu.matmul %1, %245, %cst_97 {dimension_numbers = #tpu.dot_dimension_numbers<[0], [0], [1], [1], [0, 1, 1, 1], [], []>} : vector<8x32xbf16>, vector<8x32xbf16>, vector<32x32xf32> -> vector<32x32xf32>
    %cst_98 = arith.constant dense<0.000000e+00> : vector<32xf32>
    %247 = vector.multi_reduction <add>, %244, %cst_98 [0] : vector<8x32xf32> to vector<32xf32>
    %248 = vector.shape_cast %247 : vector<32xf32> to vector<1x32xf32>
    %cst_99 = arith.constant 0.899999976 : f32
    %249 = vector.broadcast %cst_99 : f32 to vector<32x32xf32>
    %250 = arith.mulf %249, %148 : vector<32x32xf32>
    %cst_100 = arith.constant 1.000000e-01 : f32
    %251 = vector.broadcast %cst_100 : f32 to vector<32x32xf32>
    %252 = arith.mulf %251, %246 : vector<32x32xf32>
    %253 = arith.addf %250, %252 : vector<32x32xf32>
    %cst_101 = arith.constant 9.990000e-01 : f32
    %254 = vector.broadcast %cst_101 : f32 to vector<32x32xf32>
    %255 = arith.mulf %254, %154 : vector<32x32xf32>
    %256 = arith.mulf %246, %246 : vector<32x32xf32>
    %cst_102 = arith.constant 1.000000e-03 : f32
    %257 = vector.broadcast %cst_102 : f32 to vector<32x32xf32>
    %258 = arith.mulf %257, %256 : vector<32x32xf32>
    %259 = arith.addf %255, %258 : vector<32x32xf32>
    %cst_103 = arith.constant 0.0369003676 : f32
    %260 = vector.broadcast %cst_103 : f32 to vector<32x32xf32>
    %261 = arith.mulf %260, %253 : vector<32x32xf32>
    %cst_104 = arith.constant 333.666901 : f32
    %262 = vector.broadcast %cst_104 : f32 to vector<32x32xf32>
    %263 = arith.mulf %259, %262 : vector<32x32xf32>
    %264 = math.sqrt %263 : vector<32x32xf32>
    %cst_105 = arith.constant 9.99999993E-9 : f32
    %265 = vector.broadcast %cst_105 : f32 to vector<32x32xf32>
    %266 = arith.addf %264, %265 : vector<32x32xf32>
    %267 = arith.divf %261, %266 : vector<32x32xf32>
    %268 = arith.subf %163, %267 : vector<32x32xf32>
    %cst_106 = arith.constant 0.899999976 : f32
    %269 = vector.broadcast %cst_106 : f32 to vector<1x32xf32>
    %270 = arith.mulf %269, %168 : vector<1x32xf32>
    %cst_107 = arith.constant 1.000000e-01 : f32
    %271 = vector.broadcast %cst_107 : f32 to vector<1x32xf32>
    %272 = arith.mulf %271, %248 : vector<1x32xf32>
    %273 = arith.addf %270, %272 : vector<1x32xf32>
    %cst_108 = arith.constant 9.990000e-01 : f32
    %274 = vector.broadcast %cst_108 : f32 to vector<1x32xf32>
    %275 = arith.mulf %274, %174 : vector<1x32xf32>
    %276 = arith.mulf %248, %248 : vector<1x32xf32>
    %cst_109 = arith.constant 1.000000e-03 : f32
    %277 = vector.broadcast %cst_109 : f32 to vector<1x32xf32>
    %278 = arith.mulf %277, %276 : vector<1x32xf32>
    %279 = arith.addf %275, %278 : vector<1x32xf32>
    %cst_110 = arith.constant 0.0369003676 : f32
    %280 = vector.broadcast %cst_110 : f32 to vector<1x32xf32>
    %281 = arith.mulf %280, %273 : vector<1x32xf32>
    %cst_111 = arith.constant 333.666901 : f32
    %282 = vector.broadcast %cst_111 : f32 to vector<1x32xf32>
    %283 = arith.mulf %279, %282 : vector<1x32xf32>
    %284 = math.sqrt %283 : vector<1x32xf32>
    %cst_112 = arith.constant 9.99999993E-9 : f32
    %285 = vector.broadcast %cst_112 : f32 to vector<1x32xf32>
    %286 = arith.addf %284, %285 : vector<1x32xf32>
    %287 = arith.divf %281, %286 : vector<1x32xf32>
    %288 = arith.subf %183, %287 : vector<1x32xf32>
    %cst_113 = arith.constant 0.899999976 : f32
    %289 = vector.broadcast %cst_113 : f32 to vector<32x8xf32>
    %290 = arith.mulf %289, %188 : vector<32x8xf32>
    %cst_114 = arith.constant 1.000000e-01 : f32
    %291 = vector.broadcast %cst_114 : f32 to vector<32x8xf32>
    %292 = arith.mulf %291, %237 : vector<32x8xf32>
    %293 = arith.addf %290, %292 : vector<32x8xf32>
    %cst_115 = arith.constant 9.990000e-01 : f32
    %294 = vector.broadcast %cst_115 : f32 to vector<32x8xf32>
    %295 = arith.mulf %294, %194 : vector<32x8xf32>
    %296 = arith.mulf %237, %237 : vector<32x8xf32>
    %cst_116 = arith.constant 1.000000e-03 : f32
    %297 = vector.broadcast %cst_116 : f32 to vector<32x8xf32>
    %298 = arith.mulf %297, %296 : vector<32x8xf32>
    %299 = arith.addf %295, %298 : vector<32x8xf32>
    %cst_117 = arith.constant 0.0369003676 : f32
    %300 = vector.broadcast %cst_117 : f32 to vector<32x8xf32>
    %301 = arith.mulf %300, %293 : vector<32x8xf32>
    %cst_118 = arith.constant 333.666901 : f32
    %302 = vector.broadcast %cst_118 : f32 to vector<32x8xf32>
    %303 = arith.mulf %299, %302 : vector<32x8xf32>
    %304 = math.sqrt %303 : vector<32x8xf32>
    %cst_119 = arith.constant 9.99999993E-9 : f32
    %305 = vector.broadcast %cst_119 : f32 to vector<32x8xf32>
    %306 = arith.addf %304, %305 : vector<32x8xf32>
    %307 = arith.divf %301, %306 : vector<32x8xf32>
    %308 = arith.subf %203, %307 : vector<32x8xf32>
    %cst_120 = arith.constant 0.899999976 : f32
    %309 = vector.broadcast %cst_120 : f32 to vector<1x8xf32>
    %310 = arith.mulf %309, %208 : vector<1x8xf32>
    %cst_121 = arith.constant 1.000000e-01 : f32
    %311 = vector.broadcast %cst_121 : f32 to vector<1x8xf32>
    %312 = arith.mulf %311, %239 : vector<1x8xf32>
    %313 = arith.addf %310, %312 : vector<1x8xf32>
    %cst_122 = arith.constant 9.990000e-01 : f32
    %314 = vector.broadcast %cst_122 : f32 to vector<1x8xf32>
    %315 = arith.mulf %314, %214 : vector<1x8xf32>
    %316 = arith.mulf %239, %239 : vector<1x8xf32>
    %cst_123 = arith.constant 1.000000e-03 : f32
    %317 = vector.broadcast %cst_123 : f32 to vector<1x8xf32>
    %318 = arith.mulf %317, %316 : vector<1x8xf32>
    %319 = arith.addf %315, %318 : vector<1x8xf32>
    %cst_124 = arith.constant 0.0369003676 : f32
    %320 = vector.broadcast %cst_124 : f32 to vector<1x8xf32>
    %321 = arith.mulf %320, %313 : vector<1x8xf32>
    %cst_125 = arith.constant 333.666901 : f32
    %322 = vector.broadcast %cst_125 : f32 to vector<1x8xf32>
    %323 = arith.mulf %319, %322 : vector<1x8xf32>
    %324 = math.sqrt %323 : vector<1x8xf32>
    %cst_126 = arith.constant 9.99999993E-9 : f32
    %325 = vector.broadcast %cst_126 : f32 to vector<1x8xf32>
    %326 = arith.addf %324, %325 : vector<1x8xf32>
    %327 = arith.divf %321, %326 : vector<1x8xf32>
    %328 = arith.subf %223, %327 : vector<1x8xf32>
    %c0_127 = arith.constant 0 : index
    %c0_128 = arith.constant 0 : index
    %329 = vector.load %arg1[%c0_127, %c0_128] : memref<8x32xf32, #tpu.memory_space<vmem>>, vector<8x32xf32>
    %330 = arith.truncf %329 : vector<8x32xf32> to vector<8x32xbf16>
    %331 = arith.truncf %268 : vector<32x32xf32> to vector<32x32xbf16>
    %332 = arith.truncf %308 : vector<32x8xf32> to vector<32x8xbf16>
    %cst_129 = arith.constant dense<0.000000e+00> : vector<8x32xf32>
    %333 = tpu.matmul %330, %331, %cst_129 {dimension_numbers = #tpu.dot_dimension_numbers<[1], [0], [0], [1], [0, 0, 1, 1], [], []>} : vector<8x32xbf16>, vector<32x32xbf16>, vector<8x32xf32> -> vector<8x32xf32>
    %334 = vector.broadcast %288 : vector<1x32xf32> to vector<8x32xf32>
    %335 = arith.addf %333, %334 : vector<8x32xf32>
    %336 = math.tanh %335 : vector<8x32xf32>
    %337 = arith.truncf %336 : vector<8x32xf32> to vector<8x32xbf16>
    %cst_130 = arith.constant dense<0.000000e+00> : vector<8x8xf32>
    %338 = tpu.matmul %337, %332, %cst_130 {dimension_numbers = #tpu.dot_dimension_numbers<[1], [0], [0], [1], [0, 0, 1, 1], [], []>} : vector<8x32xbf16>, vector<32x8xbf16>, vector<8x8xf32> -> vector<8x8xf32>
    %339 = vector.broadcast %328 : vector<1x8xf32> to vector<8x8xf32>
    %340 = arith.addf %338, %339 : vector<8x8xf32>
    %cst_131 = arith.constant 3.125000e-02 : f32
    %341 = vector.broadcast %cst_131 : f32 to vector<8x8xf32>
    %342 = arith.mulf %341, %340 : vector<8x8xf32>
    %343 = arith.truncf %342 : vector<8x8xf32> to vector<8x8xbf16>
    %cst_132 = arith.constant dense<0.000000e+00> : vector<32x8xf32>
    %344 = tpu.matmul %337, %343, %cst_132 {dimension_numbers = #tpu.dot_dimension_numbers<[0], [0], [1], [1], [0, 1, 1, 1], [], []>} : vector<8x32xbf16>, vector<8x8xbf16>, vector<32x8xf32> -> vector<32x8xf32>
    %cst_133 = arith.constant dense<0.000000e+00> : vector<8xf32>
    %345 = vector.multi_reduction <add>, %342, %cst_133 [0] : vector<8x8xf32> to vector<8xf32>
    %346 = vector.shape_cast %345 : vector<8xf32> to vector<1x8xf32>
    %cst_134 = arith.constant dense<0.000000e+00> : vector<8x32xf32>
    %347 = tpu.matmul %343, %332, %cst_134 {dimension_numbers = #tpu.dot_dimension_numbers<[1], [1], [0], [0], [0, 0, 1, 0], [], []>} : vector<8x8xbf16>, vector<32x8xbf16>, vector<8x32xf32> -> vector<8x32xf32>
    %348 = arith.mulf %336, %336 : vector<8x32xf32>
    %cst_135 = arith.constant 1.000000e+00 : f32
    %349 = vector.broadcast %cst_135 : f32 to vector<8x32xf32>
    %350 = arith.subf %349, %348 : vector<8x32xf32>
    %351 = arith.mulf %347, %350 : vector<8x32xf32>
    %352 = arith.truncf %351 : vector<8x32xf32> to vector<8x32xbf16>
    %cst_136 = arith.constant dense<0.000000e+00> : vector<32x32xf32>
    %353 = tpu.matmul %330, %352, %cst_136 {dimension_numbers = #tpu.dot_dimension_numbers<[0], [0], [1], [1], [0, 1, 1, 1], [], []>} : vector<8x32xbf16>, vector<8x32xbf16>, vector<32x32xf32> -> vector<32x32xf32>
    %cst_137 = arith.constant dense<0.000000e+00> : vector<32xf32>
    %354 = vector.multi_reduction <add>, %351, %cst_137 [0] : vector<8x32xf32> to vector<32xf32>
    %355 = vector.shape_cast %354 : vector<32xf32> to vector<1x32xf32>
    %356 = arith.mulf %340, %340 : vector<8x8xf32>
    %cst_138 = arith.constant dense<0.000000e+00> : vector<8xf32>
    %357 = vector.multi_reduction <add>, %356, %cst_138 [1] : vector<8x8xf32> to vector<8xf32>
    %358 = vector.shape_cast %357 : vector<8xf32> to vector<8x1xf32>
    %cst_139 = arith.constant dense<0.000000e+00> : vector<1xf32>
    %359 = vector.multi_reduction <add>, %358, %cst_139 [0] : vector<8x1xf32> to vector<1xf32>
    %360 = vector.shape_cast %359 : vector<1xf32> to vector<1x1xf32>
    %cst_140 = arith.constant 1.562500e-02 : f32
    %361 = vector.broadcast %cst_140 : f32 to vector<1x1xf32>
    %362 = arith.mulf %360, %361 : vector<1x1xf32>
    %c0_141 = arith.constant 0 : index
    %c0_142 = arith.constant 0 : index
    %363 = vector.load %arg6[%c0_141, %c0_142] : memref<1x1xf32, #tpu.memory_space<vmem>>, vector<1x1xf32>
    tpu.vector_store %arg6[%c0_141, %c0_142], %362 {strides = array<i32>} : memref<1x1xf32, #tpu.memory_space<vmem>>, vector<1x1xf32>,
    %c0_143 = arith.constant 0 : index
    %c0_144 = arith.constant 0 : index
    %364 = vector.load %arg7[%c0_143, %c0_144] : memref<32x32xf32, #tpu.memory_space<vmem>>, vector<32x32xf32>
    tpu.vector_store %arg7[%c0_143, %c0_144], %353 {strides = array<i32>} : memref<32x32xf32, #tpu.memory_space<vmem>>, vector<32x32xf32>,
    %c0_145 = arith.constant 0 : index
    %c0_146 = arith.constant 0 : index
    %365 = vector.load %arg8[%c0_145, %c0_146] : memref<1x32xf32, #tpu.memory_space<vmem>>, vector<1x32xf32>
    tpu.vector_store %arg8[%c0_145, %c0_146], %355 {strides = array<i32>} : memref<1x32xf32, #tpu.memory_space<vmem>>, vector<1x32xf32>,
    %c0_147 = arith.constant 0 : index
    %c0_148 = arith.constant 0 : index
    %366 = vector.load %arg9[%c0_147, %c0_148] : memref<32x8xf32, #tpu.memory_space<vmem>>, vector<32x8xf32>
    tpu.vector_store %arg9[%c0_147, %c0_148], %344 {strides = array<i32>} : memref<32x8xf32, #tpu.memory_space<vmem>>, vector<32x8xf32>,
    %c0_149 = arith.constant 0 : index
    %c0_150 = arith.constant 0 : index
    %367 = vector.load %arg10[%c0_149, %c0_150] : memref<1x8xf32, #tpu.memory_space<vmem>>, vector<1x8xf32>
    tpu.vector_store %arg10[%c0_149, %c0_150], %346 {strides = array<i32>} : memref<1x8xf32, #tpu.memory_space<vmem>>, vector<1x8xf32>,
    return
  }
}

</mosaic_0001>

<bundles_post_ra>
// kernel: tpu_custom_call.1
= control target key start
LH: loop header
LB: loop body
LE: loop exit
PB: predicated region body
PF: predicated region fallthrough
CT: control target
= control target key end

     0   :  { %16 = vsyncpa [#allocation3], 0  ;;  %s3127_s0 = inlined_call_operand.vmem [shape: f32[8,32], index: 0, kind: input, shape index: {}]   ;;  %s3128_s1 = inlined_call_operand.hbm [shape: f32[8,32], index: 1, kind: input, shape index: {}]   ;;  %s3129_s2 = inlined_call_operand.vmem [shape: f32[32,32], index: 2, kind: input, shape index: {}]   ;;  %s3130_s3 = inlined_call_operand.vmem [shape: f32[1,32], index: 3, kind: input, shape index: {}]   ;;  %s3131_s4 = inlined_call_operand.vmem [shape: f32[32,8], index: 4, kind: input, shape index: {}]   ;;  %s3132_s5 = inlined_call_operand.vmem [shape: f32[1,8], index: 5, kind: input, shape index: {}]   ;;  %s3133_s6 = inlined_call_operand.hbm [shape: f32[1,1], index: 6, kind: output, shape index: {0}]   ;;  %s3134_s7 = inlined_call_operand.hbm [shape: f32[32,32], index: 7, kind: output, shape index: {1}]   ;;  %s3135_s8 = inlined_call_operand.hbm [shape: f32[1,32], index: 8, kind: output, shape index: {2}]   ;;  %s3136_s9 = inlined_call_operand.vmem [shape: f32[32,8], index: 9, kind: output, shape index: {3}]   ;;  %s3137_s10 = inlined_call_operand.hbm [shape: f32[1,8], index: 10, kind: output, shape index: {4}]  }
   0x1   :  { %17 = vsyncpa [#allocation4], 0 }
   0x2   :  { %18 = vsyncpa [#allocation7], 0 }
   0x3   :  { %19 = vsyncpa [#allocation10], 0  ;;  %s2454_s13 = smov [#allocation2]   ;;  %s2336_s17 = scalar_lea.hbm %s3128_s1, 128 }
   0x4   :  { %s28_s14 = sshll.u32 %s2454_s13, 4  ;;  %p2337_p0 = scmp.ne.s32.totalorder %s3128_s1, %s2336_s17  ;;  %s29_s14 = int_to_ptr.vmem [resolvable:$true] %s28_s14 }
   0x5   :  { %p2340_p1 = scmp.lt.u32.totalorder %s2336_s17, %s3128_s1 }
   0x7   :  { %p2342_p2 = pnand %p2340_p1, %p2337_p0 }
   0x9   :  { %2345 = shalt.err (!%p2342_p2)
}
   0xa   :  { %s2346_s22 = scalar_lea.vmem %s29_s14, 128  ;;  %p2351_p4 = scmp.lt.s32.totalorder %s29_s14, %s29_s14 }
   0xb   :  { %p2347_p3 = scmp.ne.s32.totalorder %s29_s14, %s2346_s22  ;;  %p2352_p5 = scmp.lt.s32.totalorder %s2346_s22, %s2346_s22 }
   0xd   :  { %p2353_p6 = por %p2352_p5, %p2351_p4 }
   0xf   :  { %p2354_p7 = pnand %p2353_p6, %p2347_p3 }
  0x11   :  { %2357 = shalt.err (!%p2354_p7)
}
  0x12   :  { %31 = dma.hbm_to_vmem [thread:$0]  %s3128_s1, 128, %s29_s14, [#allocation3]  }
  0x13   :  { %2446 = dma.done.wait [#allocation3], 128  }
  0x14   :  { %2447 = vsyncadd [#allocation3], 4294967168  ;;  %v2455_v0 = vmov 0.0   ;;  %vm2456_vm0 = vmmov 0   ;;  %v2539_v1 = vld [vmem:[%s3129_s2] sm:$0xff]  ;;  %v2544_v2 = vld [vmem:[%s3129_s2 + $0x8] sm:$0xff]  ;;  %v61_v15 = vlaneseq }
  0x15   :  { %2046 = vmatprep.subr.bf16.mxu0 %v2455_v0  ;;  %2050 = vmatprep.mubr.msk.bf16.mxu0 %vm2456_vm0, %v2455_v0  ;;  %v2549_v3 = vld [vmem:[%s3129_s2 + $0x10] sm:$0xff]  ;;  %v56_v4 = vpack.c.bf16 %v2544_v2, %v2539_v1  ;;  %v2556_v5 = vld [vmem:[%s3129_s2 + $0x18] sm:$0xff]  ;;  %v44_v7 = vld [vmem:[%s3127_s0] sm:$0xff]  ;;  %vm66_vm1 = vcmask 261120   ;;  %vm179_vm2 = vcmask 64512   ;;  %vm186_vm3 = vcmask 1043456  }
  0x16   :  { %2054 = vmatprep.subr.bf16.mxu1 %v2455_v0  ;;  %2058 = vmatprep.mubr.msk.bf16.mxu1 %vm2456_vm0, %v2455_v0  ;;  %v57_v6 = vpack.c.bf16 %v2556_v5, %v2549_v3  ;;  %v2564_v8 = vpack.c.bf16 %v44_v7, %v44_v7  ;;  %v2571_v9 = vld [vmem:[%s3131_s4] sm:$0xff]  ;;  %v2576_v10 = vld [vmem:[%s3131_s4 + $0x8] sm:$0xff]  ;;  %v2581_v11 = vld [vmem:[%s3131_s4 + $0x10] sm:$0xff]  ;;  %v62_v16 = vshrl.u32 %v61_v15, 7  ;;  %s2457_s28 = smov [#allocation5]  }
  0x17   :  { %2047 = vmatpush3.bf16.msra.mxu0 %v56_v4  ;;  %v58_v12 = vpack.c.bf16 %v2576_v10, %v2571_v9  ;;  %v2588_v13 = vld [vmem:[%s3131_s4 + $0x18] sm:$0xff]  ;;  %v2599_v18 = vld [vmem:[%s3130_s3] sm:$0x1]  ;;  %s1902_s29 = sshll.u32 %s2457_s28, 4  ;;  %s1903_s29 = int_to_ptr.vmem [resolvable:$true] %s1902_s29 }
  0x18   :  { %2048 = vmatprep.subr.bf16.mxu0 %v2455_v0  ;;  %v59_v14 = vpack.c.bf16 %v2588_v13, %v2581_v11  ;;  %v2594_v17 = vsub.s32 0, %v62_v16  ;;  %v2615_v30 = vld [vmem:[%s3132_s5] sm:$0x1]  ;;  %s2358_s30 = scalar_lea.vmem %s1903_s29, 16  ;;  %s2362_s11 = scalar_lea.vmem %s1903_s29, 32 }
  0x19   :  { %2055 = vmatpush3.bf16.msra.mxu1 %v58_v12  ;;  %v249_v27 = vsel %vm179_vm2, %v58_v12, 0  ;;  %p2359_p8 = scmp.ne.s32.totalorder %s1903_s29, %s2358_s30  ;;  %p2363_p9 = scmp.lt.s32.totalorder %s1903_s29, %s1903_s29 }
  0x1a   :  { %2056 = vmatprep.subr.bf16.mxu1 %v2455_v0  ;;  %v64_v19 = vrot.slane %v2599_v18, %v2594_v17  ;;  %v252_v28 = vsel %vm179_vm2, %v59_v14, 0  ;;  %v116_v31 = vrot.slane %v2615_v30, %v2594_v17  ;;  %p2364_p10 = scmp.lt.s32.totalorder %s2362_s11, %s2358_s30 }
  0x1b   :  { %2049 = vmatpush3.bf16.msra.mxu0 %v57_v6 }
  0x1c   :  { %p2365_p11 = por %p2364_p10, %p2363_p9 }
  0x1d   :  { %2057 = vmatpush3.bf16.msra.mxu1 %v59_v14 }
  0x1e   :  { %2051 = vmatmul.mubr.msk.bf16.vlgmr.msra.gmra.mrb[0].mxu0 %vm66_vm1, %v2564_v8  ;;  %2068 = vmatprep.subr.bf16.mxu1 %v2455_v0  ;;  %p2366_p12 = pnand %p2365_p11, %p2359_p8 }
  0xf1   :  { %v104_v20 = vpop.f32.mrb[0].mxu0 }
  0xf2   :  { %v105_v21 = vadd.f32 %v104_v20, %v64_v19  ;;  %v2052_v22 = vpop.f32.mrb[1].mxu0 }
  0xf3   :  { %v107_v23 = vpop.f32.mrb[2].mxu0 }
  0xf4   :  { %2208 = vtanh.f32 %v105_v21  ;;  %v2053_v24 = vpop.f32.mrb[3].mxu0 }
  0xfe   :  { %v2209_v25 = vpop.eup %2208 }
  0xff   :  { %v111_v26 = vpack.c.bf16 %v2209_v25, %v2209_v25  ;;  %v294_v42 = vmul.f32 %v2209_v25, %v2209_v25 }
 0x101   :  { %163 = vxpose.xlu0.c.b16.start.end [1/1] (short) (narrow) %v111_v26, 32  ;;  %2059 = vmatmul.mubr.msk.bf16.vlgmr.msra.gmra.mrb[0].mxu1 %vm66_vm1, %v111_v26  ;;  %v295_v43 = vsub.f32 1.0, %v294_v42 }
 0x102   :  { %2069 = vmatpush3.bf16.xpose.msra.mxu1 %v249_v27  ;;  %2072 = vmatprep.mubr.msk.bf16.mxu1 %vm2456_vm0, %v2455_v0 }
 0x103   :  { %2070 = vmatprep.subr.bf16.mxu1 %v2455_v0 }
 0x106   :  { %298 = vxpose.xlu0.c.b16.start.end [1/1] (short) (narrow) %v2564_v8, 32 }
 0x10a   :  { %2071 = vmatpush3.bf16.xpose.msra.mxu1 %v252_v28 }
 0x10b   :  { %2090 = vmatprep.subr.bf16.mxu1 %v2455_v0 }
 0x167   :  { %v171_v29 = vpop.trf.xlu0 }
 0x168   :  { %2064 = vmatprep.mubr.msk.bf16.mxu0 %vm179_vm2, %v171_v29 }
 0x16b   :  { %v172_v40 = vpop.trf.xlu0 }
 0x16f   :  { %v2629_v41 = vpop.trf.xlu0 }
 0x173   :  { %v2641_v53 = vpop.trf.xlu0 }
 0x1d4   :  { %v155_v32 = vpop.f32.mrb[0].mxu1 }
 0x1d5   :  { %v156_v33 = vadd.f32 %v155_v32, %v116_v31  ;;  %v2060_v34 = vpop.f32.mrb[1].mxu1 }
 0x1d6   :  { %v158_v35 = vpop.f32.mrb[2].mxu1 }
 0x1d7   :  { %v2619_v36 = vmul.f32 0.03125, %v156_v33  ;;  %v2061_v37 = vpop.f32.mrb[3].mxu1 }
 0x1d9   :  { %v162_v38 = vpack.c.bf16 %v2619_v36, %v2619_v36 }
 0x1db   :  { %2190 = vmatprep.subr.msk.bf16.mxu0 %vm186_vm3, %v162_v38  ;;  %2073 = vmatmul.mubr.msk.bf16.vlgmr.msra.gmra.mrb[4].mxu1 %vm179_vm2, %v162_v38  ;;  %v188_v39 = vsel %vm186_vm3, %v162_v38, 0 }
 0x1dc   :  { %2063 = vmatpush3.bf16.msra.mxu0 %v188_v39  ;;  %2094 = vmatprep.mubr.msk.bf16.mxu1 %vm2456_vm0, %v2455_v0 }
 0x1df   :  { %2065 = vmatmul.mubr.msk.bf16.vlgmr.msra.gmra.mrb[4].mxu0 %vm179_vm2, %v172_v40 }
 0x1e0   :  { %2078 = vmatprep.mubr.msk.bf16.mxu0 %vm179_vm2, %v2629_v41 }
 0x2ae   :  { %v288_v44 = vpop.f32.mrb[4].mxu1 }
 0x2af   :  { %v2633_v45 = vmul.f32 %v295_v43, %v288_v44  ;;  %v2074_v46 = vpop.f32.mrb[5].mxu1 }
 0x2b0   :  { %v291_v47 = vpop.f32.mrb[6].mxu1 }
 0x2b1   :  { %v297_v48 = vpack.c.bf16 %v2633_v45, %v2633_v45  ;;  %v2075_v49 = vpop.f32.mrb[7].mxu1 }
 0x2b2   :  { %v2637_v50 = vpop.f32.mrb[4].mxu0 }
 0x2b3   :  { %2191 = vmatprep.subr.msk.bf16.mxu0 %vm186_vm3, %v297_v48  ;;  %v321_v51 = vsel %vm186_vm3, %v297_v48, 0  ;;  %v224_v52 = vpop.f32.mrb[5].mxu0  ;;  %v479_v23 = vmul.f32 %v2637_v50, %v2637_v50 }
 0x2b4   :  { %2077 = vmatpush3.bf16.msra.mxu0 %v321_v51  ;;  %v477_v54 = vmul.f32 %v224_v52, %v224_v52  ;;  %v2643_v55 = vpop.f32.mrb[6].mxu0  ;;  %v2656_v22 = vmul.f32 0.1, %v224_v52 }
 0x2b5   :  { %2082 = vmatprep.subr.bf16.mxu0 %v2455_v0  ;;  %v227_v57 = vpop.f32.mrb[7].mxu0  ;;  %v480_v27 = vmul.f32 %v2643_v55, %v2643_v55  ;;  %v2665_v28 = vmul.f32 0.001, %v479_v23 }
 0x2b6   :  { %v2646_v56 = vmul.f32 0.001, %v477_v54  ;;  %v478_v59 = vmul.f32 %v227_v57, %v227_v57  ;;  %v489_v24 = vmul.f32 0.1, %v2656_v22  ;;  %v2661_v25 = vmul.f32 0.1, %v227_v57 }
 0x2b7   :  { %2079 = vmatmul.mubr.msk.bf16.vlgmr.msra.gmra.mrb[8].mxu0 %vm179_vm2, %v2641_v53  ;;  %v2668_v32 = vmul.f32 0.001, %v480_v27  ;;  %v495_v34 = vmul.f32 1000.0, %v2665_v28  ;;  %v2685_v57 = vmul.f32 0.1, %v2637_v50 }
 0x2b8   :  { %v493_v58 = vmul.f32 1000.0, %v2646_v56  ;;  %2086 = vmatprep.mubr.msk.bf16.mxu0 %vm2456_vm0, %v2455_v0  ;;  %v2653_v60 = vmul.f32 0.001, %v478_v59  ;;  %v490_v31 = vmul.f32 0.1, %v2661_v25 }
 0x2b9   :  { %v496_v38 = vmul.f32 1000.0, %v2668_v32  ;;  %vm513_vm8 = vcmp.eq.f32.partialorder %v495_v34, inf  ;;  %v516_v46 = vand.u32 2147483648, %v495_v34  ;;  %vm515_vm10 = vcmp.eq.f32.partialorder %v495_v34, 0.0 }
 0x2ba   :  { %2210 = vrsqrt.f32 %v493_v58  ;;  %v494_v61 = vmul.f32 1000.0, %v2653_v60  ;;  %vm499_vm4 = vcmp.eq.f32.partialorder %v493_v58, inf  ;;  %v502_v63 = vand.u32 2147483648, %v493_v58 }
 0x2bb   :  { %vm501_vm5 = vcmp.eq.f32.partialorder %v493_v58, 0.0  ;;  %vm520_vm9 = vcmp.eq.f32.partialorder %v496_v38, inf  ;;  %vm522_vm11 = vcmp.eq.f32.partialorder %v496_v38, 0.0 }
 0x2bc   :  { %2212 = vrsqrt.f32 %v494_v61  ;;  %vm506_vm6 = vcmp.eq.f32.partialorder %v494_v61, inf  ;;  %v509_v15 = vand.u32 2147483648, %v494_v61  ;;  %vm508_vm7 = vcmp.eq.f32.partialorder %v494_v61, 0.0 }
 0x2c4   :  { %v2211_v62 = vpop.eup %2210 }
 0x2c5   :  { %v498_v4 = vmul.f32 %v2211_v62, %v493_v58 }
 0x2c6   :  { %v2213_v14 = vpop.eup %2212 }
 0x2c7   :  { %v500_v6 = vsel %vm499_vm4, %v493_v58, %v498_v4  ;;  %v505_v16 = vmul.f32 %v2213_v14, %v494_v61  ;;  %v2688_v58 = vmul.f32 0.1, %v2643_v55 }
 0x2c8   :  { %v503_v7 = vsel %vm501_vm5, %v502_v63, %v500_v6 }
 0x2c9   :  { %v525_v12 = vadd.f32 1e-08, %v503_v7  ;;  %v507_v19 = vsel %vm506_vm6, %v494_v61, %v505_v16  ;;  %v491_v61 = vmul.f32 0.1, %v2685_v57  ;;  %v492_v62 = vmul.f32 0.1, %v2688_v58 }
 0x2ca   :  { %v510_v20 = vsel %vm508_vm7, %v509_v15, %v507_v19 }
 0x2cb   :  { %2214 = vrcp.f32 %v525_v12  ;;  %v526_v21 = vadd.f32 1e-08, %v510_v20 }
 0x2cd   :  { %2216 = vrcp.f32 %v526_v21 }
 0x2ce   :  { %2218 = vrsqrt.f32 %v495_v34 }
 0x2cf   :  { %2220 = vrsqrt.f32 %v496_v38 }
 0x2d5   :  { %v2215_v26 = vpop.eup %2214 }
 0x2d6   :  { %v530_v29 = vmul.f32 %v2215_v26, %v489_v24 }
 0x2d7   :  { %v2217_v33 = vpop.eup %2216 }
 0x2d8   :  { %v2672_v35 = vsub.f32 %v2571_v9, %v530_v29  ;;  %v532_v37 = vmul.f32 %v2217_v33, %v490_v31  ;;  %v2219_v42 = vpop.eup %2218 }
 0x2d9   :  { %v2221_v43 = vpop.eup %2220  ;;  %v512_v9 = vmul.f32 %v2219_v42, %v495_v34 }
 0x2da   :  { %v2676_v39 = vsub.f32 %v2576_v10, %v532_v37  ;;  %v519_v44 = vmul.f32 %v2221_v43, %v496_v38  ;;  %v523_v10 = vand.u32 2147483648, %v496_v38 }
 0x2db   :  { %v514_v47 = vsel %vm513_vm8, %v495_v34, %v512_v9 }
 0x2dc   :  { %v2680_v40 = vpack.c.bf16 %v2676_v39, %v2672_v35  ;;  %v521_v48 = vsel %vm520_vm9, %v496_v38, %v519_v44  ;;  %v517_v49 = vsel %vm515_vm10, %v516_v46, %v514_v47 }
 0x2dd   :  { %v524_v51 = vsel %vm522_vm11, %v523_v10, %v521_v48  ;;  %v527_v52 = vadd.f32 1e-08, %v517_v49 }
 0x2de   :  { %2091 = vmatpush3.bf16.msra.mxu1 %v2680_v40  ;;  %v528_v54 = vadd.f32 1e-08, %v524_v51 }
 0x2df   :  { %2092 = vmatprep.subr.bf16.mxu1 %v2455_v0  ;;  %2222 = vrcp.f32 %v527_v52 }
 0x2e0   :  { %2224 = vrcp.f32 %v528_v54 }
 0x2e9   :  { %v2223_v59 = vpop.eup %2222 }
 0x2ea   :  { %v2225_v63 = vpop.eup %2224  ;;  %v534_v4 = vmul.f32 %v2223_v59, %v491_v61 }
 0x2eb   :  { %v536_v6 = vmul.f32 %v2225_v63, %v492_v62 }
 0x2ec   :  { %v2693_v7 = vsub.f32 %v2581_v11, %v534_v4 }
 0x2ed   :  { %v2696_v12 = vsub.f32 %v2588_v13, %v536_v6 }
 0x2ef   :  { %v2700_v50 = vpack.c.bf16 %v2696_v12, %v2693_v7 }
 0x2f1   :  { %2093 = vmatpush3.bf16.msra.mxu1 %v2700_v50 }
 0x2f2   :  { %2104 = vmatprep.subr.bf16.mxu1 %v2455_v0 }
 0x38a   :  { %v2080_v55 = vpop.f32.mrb[8].mxu0 }
 0x38b   :  { %v389_v14 = vmul.f32 %v2080_v55, %v2080_v55  ;;  %v357_v15 = vpop.f32.mrb[9].mxu0 }
 0x38c   :  { %v387_v16 = vmul.f32 %v357_v15, %v357_v15  ;;  %v2081_v19 = vpop.f32.mrb[10].mxu0 }
 0x38d   :  { %v2704_v20 = vmul.f32 0.001, %v389_v14  ;;  %v390_v11 = vmul.f32 %v2081_v19, %v2081_v19  ;;  %v360_v23 = vpop.f32.mrb[11].mxu0 }
 0x38e   :  { %v2706_v21 = vmul.f32 0.001, %v387_v16  ;;  %v388_v27 = vmul.f32 %v360_v23, %v360_v23 }
 0x38f   :  { %v405_v13 = vmul.f32 1000.0, %v2704_v20  ;;  %v2710_v26 = vmul.f32 0.001, %v390_v11 }
 0x390   :  { %v403_v24 = vmul.f32 1000.0, %v2706_v21  ;;  %v2713_v31 = vmul.f32 0.001, %v388_v27  ;;  %v2720_v27 = vmul.f32 0.1, %v360_v23 }
 0x391   :  { %2226 = vrsqrt.f32 %v405_v13  ;;  %v406_v29 = vmul.f32 1000.0, %v2710_v26  ;;  %vm423_vm12 = vcmp.eq.f32.partialorder %v405_v13, inf  ;;  %v426_v46 = vand.u32 2147483648, %v405_v13 }
 0x392   :  { %2228 = vrsqrt.f32 %v403_v24  ;;  %v404_v33 = vmul.f32 1000.0, %v2713_v31  ;;  %vm409_vm13 = vcmp.eq.f32.partialorder %v403_v24, inf  ;;  %v412_v9 = vand.u32 2147483648, %v403_v24 }
 0x393   :  { %2230 = vrsqrt.f32 %v406_v29  ;;  %vm411_vm14 = vcmp.eq.f32.partialorder %v403_v24, 0.0  ;;  %vm425_vm15 = vcmp.eq.f32.partialorder %v405_v13, 0.0  ;;  %vm430_vm4 = vcmp.eq.f32.partialorder %v406_v29, inf }
 0x394   :  { %2232 = vrsqrt.f32 %v404_v33  ;;  %v433_v52 = vand.u32 2147483648, %v406_v29  ;;  %vm432_vm5 = vcmp.eq.f32.partialorder %v406_v29, 0.0  ;;  %vm416_vm6 = vcmp.eq.f32.partialorder %v404_v33, inf }
 0x395   :  { %v419_v6 = vand.u32 2147483648, %v404_v33  ;;  %vm418_vm7 = vcmp.eq.f32.partialorder %v404_v33, 0.0 }
 0x39b   :  { %v2227_v34 = vpop.eup %2226 }
 0x39c   :  { %v2229_v37 = vpop.eup %2228  ;;  %v422_v38 = vmul.f32 %v2227_v34, %v405_v13  ;;  %v2722_v34 = vmul.f32 0.1, %v2080_v55 }
 0x39d   :  { %v408_v42 = vmul.f32 %v2229_v37, %v403_v24  ;;  %v2231_v44 = vpop.eup %2230 }
 0x39e   :  { %v424_v43 = vsel %vm423_vm12, %v405_v13, %v422_v38  ;;  %v429_v48 = vmul.f32 %v2231_v44, %v406_v29  ;;  %v2233_v54 = vpop.eup %2232  ;;  %v2716_v13 = vmul.f32 0.1, %v357_v15  ;;  %v401_v15 = vmul.f32 0.1, %v2722_v34 }
 0x39f   :  { %v410_v47 = vsel %vm409_vm13, %v403_v24, %v408_v42  ;;  %v427_v49 = vsel %vm425_vm15, %v426_v46, %v424_v43  ;;  %v415_v62 = vmul.f32 %v2233_v54, %v404_v33  ;;  %v2718_v24 = vmul.f32 0.1, %v2081_v19 }
 0x3a0   :  { %v413_v10 = vsel %vm411_vm14, %v412_v9, %v410_v47  ;;  %v431_v59 = vsel %vm430_vm4, %v406_v29, %v429_v48  ;;  %v437_v63 = vadd.f32 1e-08, %v427_v49  ;;  %v399_v37 = vmul.f32 0.1, %v2716_v13 }
 0x3a1   :  { %v435_v51 = vadd.f32 1e-08, %v413_v10  ;;  %v434_v61 = vsel %vm432_vm5, %v433_v52, %v431_v59  ;;  %v417_v14 = vsel %vm416_vm6, %v404_v33, %v415_v62  ;;  %v402_v33 = vmul.f32 0.1, %v2718_v24 }
 0x3a2   :  { %v438_v4 = vadd.f32 1e-08, %v434_v61  ;;  %v420_v16 = vsel %vm418_vm7, %v419_v6, %v417_v14  ;;  %v400_v9 = vmul.f32 0.1, %v2720_v27 }
 0x3a3   :  { %2234 = vrcp.f32 %v435_v51  ;;  %v436_v11 = vadd.f32 1e-08, %v420_v16 }
 0x3a4   :  { %2236 = vrcp.f32 %v438_v4 }
 0x3a5   :  { %2238 = vrcp.f32 %v437_v63 }
 0x3a6   :  { %2240 = vrcp.f32 %v436_v11 }
 0x3ad   :  { %v2235_v29 = vpop.eup %2234 }
 0x3ae   :  { %v2237_v38 = vpop.eup %2236  ;;  %v440_v43 = vmul.f32 %v2235_v29, %v399_v37 }
 0x3af   :  { %v2239_v42 = vpop.eup %2238  ;;  %v446_v46 = vmul.f32 %v2237_v38, %v402_v33 }
 0x3b0   :  { %v2241_v44 = vpop.eup %2240  ;;  %v444_v47 = vmul.f32 %v2239_v42, %v401_v15  ;;  %v2729_v23 = vsub.f32 %v2539_v1, %v440_v43  ;;  %v372_v1 = vsel %vm66_vm1, %v2633_v45, 0.0 }
 0x3b1   :  { %v442_v19 = vmul.f32 %v2241_v44, %v400_v9  ;;  %v2735_v10 = vsub.f32 %v2556_v5, %v446_v46 }
 0x3b2   :  { %v2740_v49 = vsub.f32 %v2549_v3, %v444_v47 }
 0x3b3   :  { %v2732_v55 = vsub.f32 %v2544_v2, %v442_v19  ;;  %v373_v2 = vrot.slane %v372_v1, 4 }
 0x3b4   :  { %v560_v51 = vpack.c.bf16 %v2735_v10, %v2740_v49 }
 0x3b5   :  { %v559_v48 = vpack.c.bf16 %v2732_v55, %v2729_v23  ;;  %v374_v5 = vadd.f32 %v373_v2, %v372_v1  ;;  %v239_v2 = vsel %vm179_vm2, %v2619_v36, 0.0 }
 0x3b7   :  { %2083 = vmatpush3.bf16.msra.mxu0 %v559_v48  ;;  %v375_v52 = vrot.slane %v374_v5, 2 }
 0x3b8   :  { %2084 = vmatprep.subr.bf16.mxu0 %v2455_v0 }
 0x3b9   :  { %v376_v54 = vadd.f32 %v375_v52, %v374_v5  ;;  %v240_v5 = vrot.slane %v239_v2, 4 }
 0x3bb   :  { %2085 = vmatpush3.bf16.msra.mxu0 %v560_v51  ;;  %v377_v59 = vrot.slane %v376_v54, 1  ;;  %v749_v51 = vsel %vm179_vm2, %v2700_v50, 0 }
 0x3bd   :  { %v378_v3 = vadd.f32 %v377_v59, %v376_v54 }
 0x3be   :  { %2087 = vmatmul.mubr.msk.bf16.vlgmr.msra.gmra.mrb[12].mxu0 %vm66_vm1, %v2564_v8 }
 0x3bf   :  { %v453_v61 = vmul.f32 %v378_v3, %v378_v3  ;;  %v2752_v29 = vmul.f32 0.1, %v378_v3 }
 0x3c1   :  { %v2749_v62 = vmul.f32 0.001, %v453_v61  ;;  %v456_v38 = vmul.f32 0.1, %v2752_v29 }
 0x3c3   :  { %v457_v63 = vmul.f32 1000.0, %v2749_v62 }
 0x3c5   :  { %2242 = vrsqrt.f32 %v457_v63  ;;  %vm460_vm8 = vcmp.eq.f32.partialorder %v457_v63, inf  ;;  %v463_v16 = vand.u32 2147483648, %v457_v63  ;;  %vm462_vm9 = vcmp.eq.f32.partialorder %v457_v63, 0.0 }
 0x3cf   :  { %v2243_v4 = vpop.eup %2242 }
 0x3d0   :  { %v459_v6 = vmul.f32 %v2243_v4, %v457_v63 }
 0x3d2   :  { %v461_v14 = vsel %vm460_vm8, %v457_v63, %v459_v6 }
 0x3d3   :  { %v464_v11 = vsel %vm462_vm9, %v463_v16, %v461_v14 }
 0x3d4   :  { %v465_v45 = vadd.f32 1e-08, %v464_v11 }
 0x3d6   :  { %2244 = vrcp.f32 %v465_v45 }
 0x3e0   :  { %v2245_v37 = vpop.eup %2244 }
 0x3e1   :  { %v467_v42 = vmul.f32 %v2245_v37, %v456_v38 }
 0x3e3   :  { %v2756_v43 = vsub.f32 %v2599_v18, %v467_v42  ;;  %v746_v18 = vsel %vm179_vm2, %v2680_v40, 0  ;;  %v241_v40 = vadd.f32 %v240_v5, %v239_v2 }
 0x3e5   :  { %v567_v33 = vrot.slane %v2756_v43, %v2594_v17  ;;  %v242_v52 = vrot.slane %v241_v40, 2 }
 0x3e7   :  { %v243_v54 = vadd.f32 %v242_v52, %v241_v40 }
 0x3e9   :  { %v244_v59 = vrot.slane %v243_v54, 1 }
 0x3eb   :  { %v245_v3 = vadd.f32 %v244_v59, %v243_v54 }
 0x3ed   :  { %v543_v61 = vmul.f32 %v245_v3, %v245_v3  ;;  %v541_v36 = vmul.f32 0.1, %v245_v3 }
 0x3ef   :  { %v544_v63 = vmul.f32 0.001, %v543_v61  ;;  %v546_v38 = vmul.f32 0.1, %v541_v36  ;;  %v1034_v61 = vmul.f32 0.9, %v541_v36 }
 0x3f1   :  { %v547_v4 = vmul.f32 1000.0, %v544_v63 }
 0x3f3   :  { %vm550_vm10 = vcmp.eq.f32.partialorder %v547_v4, inf  ;;  %v553_v16 = vand.u32 2147483648, %v547_v4  ;;  %vm552_vm11 = vcmp.eq.f32.partialorder %v547_v4, 0.0 }
 0x491   :  { %v603_v9 = vpop.f32.mrb[12].mxu0 }
 0x492   :  { %v604_v44 = vadd.f32 %v603_v9, %v567_v33  ;;  %v2088_v15 = vpop.f32.mrb[13].mxu0 }
 0x493   :  { %v606_v46 = vpop.f32.mrb[14].mxu0 }
 0x494   :  { %2246 = vtanh.f32 %v604_v44  ;;  %v2089_v19 = vpop.f32.mrb[15].mxu0 }
 0x495   :  { %2248 = vrsqrt.f32 %v547_v4 }
 0x49e   :  { %v2760_v47 = vpop.eup %2246 }
 0x49f   :  { %v610_v48 = vpack.c.bf16 %v2760_v47, %v2760_v47  ;;  %v2249_v50 = vpop.eup %2248 }
 0x4a0   :  { %v549_v6 = vmul.f32 %v2249_v50, %v547_v4 }
 0x4a1   :  { %662 = vxpose.xlu1.c.b16.start.end [1/1] (short) (narrow) %v610_v48, 32  ;;  %2095 = vmatmul.mubr.msk.bf16.vlgmr.msra.gmra.mrb[8].mxu1 %vm66_vm1, %v610_v48 }
 0x4a2   :  { %2105 = vmatpush3.bf16.xpose.msra.mxu1 %v746_v18  ;;  %2108 = vmatprep.mubr.msk.bf16.mxu1 %vm2456_vm0, %v2455_v0  ;;  %v551_v14 = vsel %vm550_vm10, %v547_v4, %v549_v6  ;;  %v1037_v6 = vmul.f32 0.999, %v544_v63 }
 0x4a3   :  { %2106 = vmatprep.subr.bf16.mxu1 %v2455_v0  ;;  %v554_v11 = vsel %vm552_vm11, %v553_v16, %v551_v14 }
 0x4a4   :  { %v555_v45 = vadd.f32 1e-08, %v554_v11 }
 0x4a6   :  { %2250 = vrcp.f32 %v555_v45 }
 0x4aa   :  { %2107 = vmatpush3.bf16.xpose.msra.mxu1 %v749_v51 }
 0x4ab   :  { %2126 = vmatprep.subr.bf16.mxu1 %v2455_v0 }
 0x4b0   :  { %v2251_v37 = vpop.eup %2250 }
 0x4b1   :  { %v557_v42 = vmul.f32 %v2251_v37, %v546_v38 }
 0x4b3   :  { %v2777_v33 = vsub.f32 %v2615_v30, %v557_v42 }
 0x4b5   :  { %v615_v9 = vrot.slane %v2777_v33, %v2594_v17 }
 0x507   :  { %v670_v1 = vpop.trf.xlu1 }
 0x508   :  { %2100 = vmatprep.mubr.msk.bf16.mxu0 %vm179_vm2, %v670_v1 }
 0x50b   :  { %v671_v40 = vpop.trf.xlu1 }
 0x574   :  { %v654_v44 = vpop.f32.mrb[8].mxu1 }
 0x575   :  { %v655_v15 = vadd.f32 %v654_v44, %v615_v9  ;;  %v2096_v46 = vpop.f32.mrb[9].mxu1 }
 0x576   :  { %v657_v19 = vpop.f32.mrb[10].mxu1 }
 0x577   :  { %v660_v48 = vmul.f32 0.03125, %v655_v15  ;;  %v2097_v18 = vpop.f32.mrb[11].mxu1  ;;  %v791_v19 = vmul.f32 %v2760_v47, %v2760_v47  ;;  %v957_v47 = vmul.f32 0.9, %v2688_v58 }
 0x579   :  { %v661_v51 = vpack.c.bf16 %v660_v48, %v660_v48  ;;  %v736_v1 = vsel %vm179_vm2, %v660_v48, 0.0  ;;  %v792_v48 = vsub.f32 1.0, %v791_v19 }
 0x57a   :  { %v737_v2 = vrot.slane %v736_v1, 4 }
 0x57b   :  { %2192 = vmatprep.subr.msk.bf16.mxu0 %vm186_vm3, %v661_v51  ;;  %2109 = vmatmul.mubr.msk.bf16.vlgmr.msra.gmra.mrb[12].mxu1 %vm179_vm2, %v661_v51  ;;  %v685_v30 = vsel %vm186_vm3, %v661_v51, 0 }
 0x57c   :  { %v738_v5 = vadd.f32 %v737_v2, %v736_v1  ;;  %2099 = vmatpush3.bf16.msra.mxu0 %v685_v30  ;;  %2130 = vmatprep.mubr.msk.bf16.mxu1 %vm2456_vm0, %v2455_v0  ;;  %v956_v30 = vmul.f32 0.9, %v2685_v57 }
 0x57e   :  { %v739_v52 = vrot.slane %v738_v5, 2 }
 0x57f   :  { %2101 = vmatmul.mubr.msk.bf16.vlgmr.msra.gmra.mrb[16].mxu0 %vm179_vm2, %v671_v40 }
 0x580   :  { %v740_v54 = vadd.f32 %v739_v52, %v738_v5  ;;  %2114 = vmatprep.mubr.msk.bf16.mxu0 %vm179_vm2, %v2629_v41  ;;  %v968_v5 = vmul.f32 0.999, %v2665_v28  ;;  %v955_v28 = vmul.f32 0.9, %v2661_v25  ;;  %v969_v25 = vmul.f32 0.999, %v2668_v32 }
 0x582   :  { %v741_v59 = vrot.slane %v740_v54, 1 }
 0x584   :  { %v742_v3 = vadd.f32 %v741_v59, %v740_v54  ;;  %v954_v59 = vmul.f32 0.9, %v2656_v22 }
 0x586   :  { %v1035_v4 = vmul.f32 0.1, %v742_v3  ;;  %v1038_v50 = vmul.f32 %v742_v3, %v742_v3  ;;  %v966_v3 = vmul.f32 0.999, %v2646_v56 }
 0x588   :  { %v1039_v14 = vmul.f32 0.001, %v1038_v50  ;;  %v2790_v16 = vadd.f32 %v1035_v4, %v1034_v61 }
 0x58a   :  { %v2792_v11 = vadd.f32 %v1039_v14, %v1037_v6  ;;  %v1041_v36 = vmul.f32 0.05263158, %v2790_v16 }
 0x58c   :  { %v1042_v45 = vmul.f32 500.25012, %v2792_v11 }
 0x58e   :  { %2252 = vrsqrt.f32 %v1042_v45  ;;  %vm1045_vm12 = vcmp.eq.f32.partialorder %v1042_v45, inf  ;;  %v1048_v42 = vand.u32 2147483648, %v1042_v45  ;;  %vm1047_vm13 = vcmp.eq.f32.partialorder %v1042_v45, 0.0 }
 0x598   :  { %v2253_v37 = vpop.eup %2252 }
 0x599   :  { %v1044_v38 = vmul.f32 %v2253_v37, %v1042_v45 }
 0x59b   :  { %v1046_v9 = vsel %vm1045_vm12, %v1042_v45, %v1044_v38 }
 0x59c   :  { %v1049_v44 = vsel %vm1047_vm13, %v1048_v42, %v1046_v9 }
 0x59d   :  { %v1050_v15 = vadd.f32 1e-08, %v1049_v44 }
 0x59f   :  { %2254 = vrcp.f32 %v1050_v15 }
 0x5a9   :  { %v2255_v63 = vpop.eup %2254 }
 0x5aa   :  { %v2796_v46 = vmul.f32 %v2255_v63, %v1041_v36 }
 0x64e   :  { %v785_v18 = vpop.f32.mrb[12].mxu1 }
 0x64f   :  { %v793_v51 = vmul.f32 %v792_v48, %v785_v18  ;;  %v2110_v1 = vpop.f32.mrb[13].mxu1 }
 0x650   :  { %v788_v2 = vpop.f32.mrb[14].mxu1 }
 0x651   :  { %v794_v40 = vpack.c.bf16 %v793_v51, %v793_v51  ;;  %v847_v52 = vsel %vm66_vm1, %v793_v51, 0.0  ;;  %v2111_v54 = vpop.f32.mrb[15].mxu1 }
 0x652   :  { %v848_v61 = vrot.slane %v847_v52, 4  ;;  %v2102_v4 = vpop.f32.mrb[16].mxu0 }
 0x653   :  { %v960_v50 = vmul.f32 0.1, %v2102_v4  ;;  %v972_v6 = vmul.f32 %v2102_v4, %v2102_v4  ;;  %v721_v14 = vpop.f32.mrb[17].mxu0  ;;  %2193 = vmatprep.subr.msk.bf16.mxu0 %vm186_vm3, %v794_v40  ;;  %v796_v57 = vsel %vm186_vm3, %v794_v40, 0  ;;  %v934_v4 = vmul.f32 0.9, %v2752_v29 }
 0x654   :  { %v849_v45 = vadd.f32 %v848_v61, %v847_v52  ;;  %v958_v37 = vmul.f32 0.1, %v721_v14  ;;  %v970_v38 = vmul.f32 %v721_v14, %v721_v14  ;;  %v2103_v42 = vpop.f32.mrb[18].mxu0  ;;  %2113 = vmatpush3.bf16.msra.mxu0 %v796_v57  ;;  %v937_v14 = vmul.f32 0.999, %v2749_v62 }
 0x655   :  { %v2809_v22 = vadd.f32 %v960_v50, %v956_v30  ;;  %v976_v56 = vmul.f32 0.001, %v972_v6  ;;  %v961_v9 = vmul.f32 0.1, %v2103_v42  ;;  %v973_v44 = vmul.f32 %v2103_v42, %v2103_v42  ;;  %v724_v58 = vpop.f32.mrb[19].mxu0  ;;  %2118 = vmatprep.subr.bf16.mxu0 %v2455_v0 }
 0x656   :  { %v850_v15 = vrot.slane %v849_v45, 2  ;;  %v2812_v36 = vadd.f32 %v958_v37, %v954_v59  ;;  %v974_v63 = vmul.f32 0.001, %v970_v38  ;;  %v959_v19 = vmul.f32 0.1, %v724_v58 }
 0x657   :  { %v2815_v48 = vadd.f32 %v976_v56, %v968_v5  ;;  %v2817_v18 = vadd.f32 %v961_v9, %v957_v47  ;;  %v977_v51 = vmul.f32 0.001, %v973_v44  ;;  %2115 = vmatmul.mubr.msk.bf16.vlgmr.msra.gmra.mrb[20].mxu0 %vm179_vm2, %v2641_v53  ;;  %v971_v32 = vmul.f32 %v724_v58, %v724_v58 }
 0x658   :  { %v851_v1 = vadd.f32 %v850_v15, %v849_v45  ;;  %v2821_v2 = vadd.f32 %v974_v63, %v966_v3  ;;  %v2823_v30 = vadd.f32 %v959_v19, %v955_v28  ;;  %2122 = vmatprep.mubr.msk.bf16.mxu0 %vm2456_vm0, %v2455_v0  ;;  %v967_v47 = vmul.f32 0.999, %v2653_v60 }
 0x659   :  { %v988_v40 = vmul.f32 500.25012, %v2815_v48  ;;  %v2828_v52 = vadd.f32 %v977_v51, %v969_v25  ;;  %v975_v3 = vmul.f32 0.001, %v971_v32 }
 0x65a   :  { %v852_v5 = vrot.slane %v851_v1, 1  ;;  %v986_v54 = vmul.f32 500.25012, %v2821_v2 }
 0x65b   :  { %2256 = vrsqrt.f32 %v988_v40  ;;  %v989_v61 = vmul.f32 500.25012, %v2828_v52  ;;  %v2835_v28 = vadd.f32 %v975_v3, %v967_v47  ;;  %vm1006_vm14 = vcmp.eq.f32.partialorder %v988_v40, inf }
 0x65c   :  { %v853_v59 = vadd.f32 %v852_v5, %v851_v1  ;;  %2258 = vrsqrt.f32 %v986_v54  ;;  %v1009_v9 = vand.u32 2147483648, %v988_v40  ;;  %vm1008_vm15 = vcmp.eq.f32.partialorder %v988_v40, 0.0 }
 0x65d   :  { %2260 = vrsqrt.f32 %v989_v61  ;;  %v987_v38 = vmul.f32 500.25012, %v2835_v28  ;;  %vm992_vm4 = vcmp.eq.f32.partialorder %v986_v54, inf  ;;  %v995_v58 = vand.u32 2147483648, %v986_v54 }
 0x65e   :  { %v935_v50 = vmul.f32 0.1, %v853_v59  ;;  %v938_v6 = vmul.f32 %v853_v59, %v853_v59  ;;  %vm994_vm5 = vcmp.eq.f32.partialorder %v986_v54, 0.0  ;;  %vm1013_vm6 = vcmp.eq.f32.partialorder %v989_v61, inf }
 0x65f   :  { %2262 = vrsqrt.f32 %v987_v38  ;;  %v1016_v5 = vand.u32 2147483648, %v989_v61  ;;  %vm1015_vm7 = vcmp.eq.f32.partialorder %v989_v61, 0.0  ;;  %vm999_vm8 = vcmp.eq.f32.partialorder %v987_v38, inf }
 0x660   :  { %v939_v57 = vmul.f32 0.001, %v938_v6  ;;  %v2837_v45 = vadd.f32 %v935_v50, %v934_v4  ;;  %v1002_v6 = vand.u32 2147483648, %v987_v38  ;;  %vm1001_vm9 = vcmp.eq.f32.partialorder %v987_v38, 0.0 }
 0x662   :  { %v2839_v37 = vadd.f32 %v939_v57, %v937_v14 }
 0x664   :  { %v942_v42 = vmul.f32 500.25012, %v2839_v37 }
 0x665   :  { %v2257_v29 = vpop.eup %2256 }
 0x666   :  { %v2259_v56 = vpop.eup %2258  ;;  %2264 = vrsqrt.f32 %v942_v42  ;;  %v1005_v60 = vmul.f32 %v2257_v29, %v988_v40  ;;  %vm945_vm10 = vcmp.eq.f32.partialorder %v942_v42, inf  ;;  %v948_v29 = vand.u32 2147483648, %v942_v42 }
 0x667   :  { %v991_v44 = vmul.f32 %v2259_v56, %v986_v54  ;;  %v2261_v15 = vpop.eup %2260  ;;  %vm947_vm11 = vcmp.eq.f32.partialorder %v942_v42, 0.0 }
 0x668   :  { %v1007_v62 = vsel %vm1006_vm14, %v988_v40, %v1005_v60  ;;  %v1012_v1 = vmul.f32 %v2261_v15, %v989_v61 }
 0x669   :  { %v1010_v63 = vsel %vm1008_vm15, %v1009_v9, %v1007_v62  ;;  %v993_v19 = vsel %vm992_vm4, %v986_v54, %v991_v44  ;;  %v2263_v4 = vpop.eup %2262 }
 0x66a   :  { %v1020_v25 = vadd.f32 1e-08, %v1010_v63  ;;  %v996_v51 = vsel %vm994_vm5, %v995_v58, %v993_v19  ;;  %v1014_v59 = vsel %vm1013_vm6, %v989_v61, %v1012_v1  ;;  %v998_v40 = vmul.f32 %v2263_v4, %v987_v38 }
 0x66b   :  { %v1018_v32 = vadd.f32 1e-08, %v996_v51  ;;  %v1017_v3 = vsel %vm1015_vm7, %v1016_v5, %v1014_v59  ;;  %v984_v61 = vmul.f32 0.05263158, %v2809_v22  ;;  %v982_v58 = vmul.f32 0.05263158, %v2812_v36 }
 0x66c   :  { %2266 = vrcp.f32 %v1020_v25  ;;  %v1021_v47 = vadd.f32 1e-08, %v1017_v3  ;;  %v1000_v14 = vsel %vm999_vm8, %v987_v38, %v998_v40  ;;  %v985_v38 = vmul.f32 0.05263158, %v2817_v18 }
 0x66d   :  { %2268 = vrcp.f32 %v1018_v32  ;;  %v1003_v57 = vsel %vm1001_vm9, %v1002_v6, %v1000_v14  ;;  %v983_v1 = vmul.f32 0.05263158, %v2823_v30  ;;  %v941_v5 = vmul.f32 0.05263158, %v2837_v45 }
 0x66e   :  { %2270 = vrcp.f32 %v1021_v47  ;;  %v1019_v56 = vadd.f32 1e-08, %v1003_v57  ;;  %v868_v14 = vmul.f32 0.999, %v2704_v20  ;;  %v857_v57 = vmul.f32 0.9, %v2718_v24 }
 0x66f   :  { %v869_v24 = vmul.f32 0.999, %v2710_v26 }
 0x670   :  { %v2265_v50 = vpop.eup %2264  ;;  %2272 = vrcp.f32 %v1019_v56 }
 0x671   :  { %v944_v54 = vmul.f32 %v2265_v50, %v942_v42 }
 0x673   :  { %v946_v60 = vsel %vm945_vm10, %v942_v42, %v944_v54  ;;  %v866_v54 = vmul.f32 0.999, %v2706_v21 }
 0x674   :  { %v949_v9 = vsel %vm947_vm11, %v948_v29, %v946_v60 }
 0x675   :  { %v950_v44 = vadd.f32 1e-08, %v949_v9  ;;  %v855_v9 = vmul.f32 0.9, %v2720_v27 }
 0x676   :  { %v2267_v62 = vpop.eup %2266 }
 0x677   :  { %v2269_v15 = vpop.eup %2268  ;;  %v1027_v63 = vmul.f32 %v2267_v62, %v984_v61  ;;  %2274 = vrcp.f32 %v950_v44 }
 0x678   :  { %v1023_v19 = vmul.f32 %v2269_v15, %v982_v58  ;;  %v2271_v25 = vpop.eup %2270 }
 0x679   :  { %v1029_v51 = vmul.f32 %v2271_v25, %v985_v38  ;;  %v2865_v6 = vsub.f32 %v2693_v7, %v1027_v63 }
 0x67a   :  { %v2273_v32 = vpop.eup %2272  ;;  %v2849_v3 = vsub.f32 %v2672_v35, %v1023_v19 }
 0x67b   :  { %v1025_v42 = vmul.f32 %v2273_v32, %v983_v1  ;;  %v2861_v50 = vsub.f32 %v2696_v12, %v1029_v51  ;;  %v854_v12 = vmul.f32 0.9, %v2716_v13  ;;  %v867_v1 = vmul.f32 0.999, %v2713_v31 }
 0x67d   :  { %v2852_v4 = vsub.f32 %v2676_v39, %v1025_v42  ;;  %v2870_v35 = vpack.c.bf16 %v2861_v50, %v2865_v6  ;;  %v856_v39 = vmul.f32 0.9, %v2722_v34 }
 0x67f   :  { %v2858_v40 = vpack.c.bf16 %v2852_v4, %v2849_v3 }
 0x681   :  { %v2275_v59 = vpop.eup %2274  ;;  %2127 = vmatpush3.bf16.msra.mxu1 %v2858_v40 }
 0x682   :  { %v2854_v47 = vmul.f32 %v2275_v59, %v941_v5  ;;  %2128 = vmatprep.subr.bf16.mxu1 %v2455_v0 }
 0x685   :  { %2129 = vmatpush3.bf16.msra.mxu1 %v2870_v35 }
 0x686   :  { %2140 = vmatprep.subr.bf16.mxu1 %v2455_v0 }
 0x72a   :  { %v2116_v7 = vpop.f32.mrb[20].mxu0 }
 0x72b   :  { %v860_v29 = vmul.f32 0.1, %v2116_v7  ;;  %v872_v56 = vmul.f32 %v2116_v7, %v2116_v7  ;;  %v832_v60 = vpop.f32.mrb[21].mxu0 }
 0x72c   :  { %v858_v61 = vmul.f32 0.1, %v832_v60  ;;  %v870_v44 = vmul.f32 %v832_v60, %v832_v60  ;;  %v2117_v62 = vpop.f32.mrb[22].mxu0 }
 0x72d   :  { %v2880_v58 = vadd.f32 %v860_v29, %v856_v39  ;;  %v876_v34 = vmul.f32 0.001, %v872_v56  ;;  %v861_v15 = vmul.f32 0.1, %v2117_v62  ;;  %v873_v13 = vmul.f32 %v2117_v62, %v2117_v62  ;;  %v835_v63 = vpop.f32.mrb[23].mxu0 }
 0x72e   :  { %v2882_v20 = vadd.f32 %v858_v61, %v854_v12  ;;  %v874_v21 = vmul.f32 0.001, %v870_v44  ;;  %v859_v19 = vmul.f32 0.1, %v835_v63  ;;  %v871_v38 = vmul.f32 %v835_v63, %v835_v63 }
 0x72f   :  { %v2885_v25 = vadd.f32 %v876_v34, %v868_v14  ;;  %v2887_v51 = vadd.f32 %v861_v15, %v857_v57  ;;  %v877_v27 = vmul.f32 0.001, %v873_v13 }
 0x730   :  { %v2890_v32 = vadd.f32 %v874_v21, %v866_v54  ;;  %v2892_v42 = vadd.f32 %v859_v19, %v855_v9  ;;  %v875_v5 = vmul.f32 0.001, %v871_v38 }
 0x731   :  { %v888_v59 = vmul.f32 500.25012, %v2885_v25  ;;  %v2895_v39 = vadd.f32 %v877_v27, %v869_v24 }
 0x732   :  { %v886_v12 = vmul.f32 500.25012, %v2890_v32  ;;  %v2898_v7 = vadd.f32 %v875_v5, %v867_v1 }
 0x733   :  { %2276 = vrsqrt.f32 %v888_v59  ;;  %v889_v26 = vmul.f32 500.25012, %v2895_v39  ;;  %vm906_vm12 = vcmp.eq.f32.partialorder %v888_v59, inf  ;;  %v909_v29 = vand.u32 2147483648, %v888_v59 }
 0x734   :  { %2278 = vrsqrt.f32 %v886_v12  ;;  %v887_v14 = vmul.f32 500.25012, %v2898_v7  ;;  %vm908_vm13 = vcmp.eq.f32.partialorder %v888_v59, 0.0  ;;  %vm892_vm14 = vcmp.eq.f32.partialorder %v886_v12, inf }
 0x735   :  { %2280 = vrsqrt.f32 %v889_v26  ;;  %v895_v9 = vand.u32 2147483648, %v886_v12  ;;  %vm894_vm15 = vcmp.eq.f32.partialorder %v886_v12, 0.0  ;;  %vm913_vm4 = vcmp.eq.f32.partialorder %v889_v26, inf }
 0x736   :  { %2282 = vrsqrt.f32 %v887_v14  ;;  %vm915_vm5 = vcmp.eq.f32.partialorder %v889_v26, 0.0  ;;  %v916_v19 = vand.u32 2147483648, %v889_v26  ;;  %vm899_vm6 = vcmp.eq.f32.partialorder %v887_v14, inf }
 0x737   :  { %v902_v27 = vand.u32 2147483648, %v887_v14  ;;  %vm901_vm7 = vcmp.eq.f32.partialorder %v887_v14, 0.0 }
 0x73d   :  { %v2277_v31 = vpop.eup %2276 }
 0x73e   :  { %v2279_v54 = vpop.eup %2278  ;;  %v905_v57 = vmul.f32 %v2277_v31, %v888_v59 }
 0x73f   :  { %v891_v56 = vmul.f32 %v2279_v54, %v886_v12  ;;  %v2281_v61 = vpop.eup %2280  ;;  %v884_v54 = vmul.f32 0.05263158, %v2880_v58 }
 0x740   :  { %v907_v60 = vsel %vm906_vm12, %v888_v59, %v905_v57  ;;  %v2283_v34 = vpop.eup %2282  ;;  %v912_v63 = vmul.f32 %v2281_v61, %v889_v26 }
 0x741   :  { %v910_v44 = vsel %vm908_vm13, %v909_v29, %v907_v60  ;;  %v893_v62 = vsel %vm892_vm14, %v886_v12, %v891_v56  ;;  %v898_v38 = vmul.f32 %v2283_v34, %v887_v14  ;;  %v882_v29 = vmul.f32 0.05263158, %v2882_v20 }
 0x742   :  { %v920_v15 = vadd.f32 1e-08, %v910_v44  ;;  %v896_v13 = vsel %vm894_vm15, %v895_v9, %v893_v62  ;;  %v914_v24 = vsel %vm913_vm4, %v889_v26, %v912_v63  ;;  %v885_v26 = vmul.f32 0.05263158, %v2887_v51 }
 0x743   :  { %v918_v21 = vadd.f32 1e-08, %v896_v13  ;;  %v917_v1 = vsel %vm915_vm5, %v916_v19, %v914_v24  ;;  %v900_v5 = vsel %vm899_vm6, %v887_v14, %v898_v38  ;;  %v883_v44 = vmul.f32 0.05263158, %v2892_v42 }
 0x744   :  { %2284 = vrcp.f32 %v920_v15  ;;  %v921_v59 = vadd.f32 1e-08, %v917_v1  ;;  %v903_v31 = vsel %vm901_vm7, %v902_v27, %v900_v5 }
 0x745   :  { %2286 = vrcp.f32 %v918_v21  ;;  %v919_v12 = vadd.f32 1e-08, %v903_v31  ;;  %v2943_v31 = vsub.f32 %v2777_v33, %v2796_v46 }
 0x746   :  { %2288 = vrcp.f32 %v921_v59 }
 0x747   :  { %2290 = vrcp.f32 %v919_v12 }
 0x74e   :  { %v2285_v57 = vpop.eup %2284 }
 0x74f   :  { %v2287_v56 = vpop.eup %2286  ;;  %v927_v60 = vmul.f32 %v2285_v57, %v884_v54 }
 0x750   :  { %v923_v9 = vmul.f32 %v2287_v56, %v882_v29  ;;  %v2289_v61 = vpop.eup %2288 }
 0x751   :  { %v2291_v62 = vpop.eup %2290  ;;  %v929_v14 = vmul.f32 %v2289_v61, %v885_v26  ;;  %v2918_v19 = vsub.f32 %v2740_v49, %v927_v60 }
 0x752   :  { %v925_v34 = vmul.f32 %v2291_v62, %v883_v44  ;;  %v2907_v15 = vsub.f32 %v2729_v23, %v923_v9  ;;  %v2927_v23 = vsub.f32 %v2756_v43, %v2854_v47  ;;  %v1244_v43 = vsel %vm179_vm2, %v2870_v35, 0 }
 0x753   :  { %v2915_v21 = vsub.f32 %v2735_v10, %v929_v14 }
 0x754   :  { %v2910_v13 = vsub.f32 %v2732_v55, %v925_v34  ;;  %v1062_v55 = vrot.slane %v2927_v23, %v2594_v17 }
 0x755   :  { %v1055_v38 = vpack.c.bf16 %v2915_v21, %v2918_v19 }
 0x756   :  { %v1054_v63 = vpack.c.bf16 %v2910_v13, %v2907_v15 }
 0x758   :  { %2119 = vmatpush3.bf16.msra.mxu0 %v1054_v63 }
 0x759   :  { %2120 = vmatprep.subr.bf16.mxu0 %v2455_v0 }
 0x75c   :  { %2121 = vmatpush3.bf16.msra.mxu0 %v1055_v38 }
 0x75f   :  { %2123 = vmatmul.mubr.msk.bf16.vlgmr.msra.gmra.mrb[24].mxu0 %vm66_vm1, %v2564_v8  ;;  %v1241_v8 = vsel %vm179_vm2, %v2858_v40, 0  ;;  %v1110_v40 = vrot.slane %v2943_v31, %v2594_v17 }
 0x832   :  { %v1098_v10 = vpop.f32.mrb[24].mxu0 }
 0x833   :  { %v1099_v24 = vadd.f32 %v1098_v10, %v1062_v55  ;;  %v2124_v49 = vpop.f32.mrb[25].mxu0  ;;  %v1529_v55 = vmul.f32 0.9, %v2790_v16  ;;  %v1532_v10 = vmul.f32 0.999, %v2792_v11 }
 0x834   :  { %v1101_v27 = vpop.f32.mrb[26].mxu0 }
 0x835   :  { %2292 = vtanh.f32 %v1099_v24  ;;  %v2125_v1 = vpop.f32.mrb[27].mxu0 }
 0x83f   :  { %v2293_v5 = vpop.eup %2292 }
 0x840   :  { %v1105_v59 = vpack.c.bf16 %v2293_v5, %v2293_v5  ;;  %v1286_v16 = vmul.f32 %v2293_v5, %v2293_v5 }
 0x842   :  { %1157 = vxpose.xlu1.c.b16.start.end [1/1] (short) (narrow) %v1105_v59, 32  ;;  %2131 = vmatmul.mubr.msk.bf16.vlgmr.msra.gmra.mrb[16].mxu1 %vm66_vm1, %v1105_v59  ;;  %v1287_v11 = vsub.f32 1.0, %v1286_v16 }
 0x843   :  { %2141 = vmatpush3.bf16.xpose.msra.mxu1 %v1241_v8  ;;  %2144 = vmatprep.mubr.msk.bf16.mxu1 %vm2456_vm0, %v2455_v0 }
 0x844   :  { %2142 = vmatprep.subr.bf16.mxu1 %v2455_v0 }
 0x84b   :  { %2143 = vmatpush3.bf16.xpose.msra.mxu1 %v1244_v43 }
 0x84c   :  { %2162 = vmatprep.subr.bf16.mxu1 %v2455_v0 }
 0x8a8   :  { %v1165_v47 = vpop.trf.xlu1 }
 0x8a9   :  { %2136 = vmatprep.mubr.msk.bf16.mxu0 %vm179_vm2, %v1165_v47 }
 0x8ac   :  { %v1166_v61 = vpop.trf.xlu1 }
 0x915   :  { %v1149_v12 = vpop.f32.mrb[16].mxu1 }
 0x916   :  { %v1150_v54 = vadd.f32 %v1149_v12, %v1110_v40  ;;  %v2132_v57 = vpop.f32.mrb[17].mxu1 }
 0x917   :  { %v1152_v29 = vpop.f32.mrb[18].mxu1 }
 0x918   :  { %v1155_v56 = vmul.f32 0.03125, %v1150_v54  ;;  %v2133_v60 = vpop.f32.mrb[19].mxu1 }
 0x91a   :  { %v1156_v35 = vpack.c.bf16 %v1155_v56, %v1155_v56  ;;  %v1231_v9 = vsel %vm179_vm2, %v1155_v56, 0.0 }
 0x91b   :  { %v1232_v26 = vrot.slane %v1231_v9, 4 }
 0x91c   :  { %2194 = vmatprep.subr.msk.bf16.mxu0 %vm186_vm3, %v1156_v35  ;;  %2145 = vmatmul.mubr.msk.bf16.vlgmr.msra.gmra.mrb[20].mxu1 %vm179_vm2, %v1156_v35  ;;  %v1180_v33 = vsel %vm186_vm3, %v1156_v35, 0 }
 0x91d   :  { %v1233_v46 = vadd.f32 %v1232_v26, %v1231_v9  ;;  %2135 = vmatpush3.bf16.msra.mxu0 %v1180_v33  ;;  %2166 = vmatprep.mubr.msk.bf16.mxu1 %vm2456_vm0, %v2455_v0 }
 0x91f   :  { %v1234_v44 = vrot.slane %v1233_v46, 2 }
 0x920   :  { %2137 = vmatmul.mubr.msk.bf16.vlgmr.msra.gmra.mrb[28].mxu0 %vm179_vm2, %v1166_v61  ;;  %v1463_v61 = vmul.f32 0.999, %v2815_v48  ;;  %v1450_v48 = vmul.f32 0.9, %v2823_v30 }
 0x921   :  { %v1235_v62 = vadd.f32 %v1234_v44, %v1233_v46  ;;  %2150 = vmatprep.mubr.msk.bf16.mxu0 %vm179_vm2, %v2629_v41  ;;  %v1451_v46 = vmul.f32 0.9, %v2809_v22 }
 0x923   :  { %v1236_v14 = vrot.slane %v1235_v62, 1 }
 0x925   :  { %v1237_v34 = vadd.f32 %v1236_v14, %v1235_v62  ;;  %v1449_v14 = vmul.f32 0.9, %v2812_v36 }
 0x927   :  { %v1530_v63 = vmul.f32 0.1, %v1237_v34  ;;  %v1533_v38 = vmul.f32 %v1237_v34, %v1237_v34  ;;  %v1461_v34 = vmul.f32 0.999, %v2821_v2 }
 0x929   :  { %v1534_v24 = vmul.f32 0.001, %v1533_v38  ;;  %v1531_v49 = vadd.f32 %v1530_v63, %v1529_v55  ;;  %v1452_v55 = vmul.f32 0.9, %v2817_v18 }
 0x92b   :  { %v1535_v27 = vadd.f32 %v1534_v24, %v1532_v10  ;;  %v1536_v12 = vmul.f32 0.036900368, %v1531_v49 }
 0x92d   :  { %v1537_v1 = vmul.f32 333.6669, %v1535_v27 }
 0x92f   :  { %2294 = vrsqrt.f32 %v1537_v1  ;;  %vm1540_vm8 = vcmp.eq.f32.partialorder %v1537_v1, inf  ;;  %v1543_v43 = vand.u32 2147483648, %v1537_v1  ;;  %vm1542_vm9 = vcmp.eq.f32.partialorder %v1537_v1, 0.0 }
 0x939   :  { %v2295_v59 = vpop.eup %2294 }
 0x93a   :  { %v1539_v8 = vmul.f32 %v2295_v59, %v1537_v1 }
 0x93c   :  { %v1541_v47 = vsel %vm1540_vm8, %v1537_v1, %v1539_v8 }
 0x93d   :  { %v1544_v41 = vsel %vm1542_vm9, %v1543_v43, %v1541_v47 }
 0x93e   :  { %v1545_v40 = vadd.f32 1e-08, %v1544_v41 }
 0x940   :  { %2296 = vrcp.f32 %v1545_v40 }
 0x94a   :  { %v2297_v54 = vpop.eup %2296 }
 0x94b   :  { %v2958_v57 = vmul.f32 %v2297_v54, %v1536_v12  ;;  %v1464_v54 = vmul.f32 0.999, %v2828_v52 }
 0x9ef   :  { %v1280_v29 = vpop.f32.mrb[20].mxu1 }
 0x9f0   :  { %v1288_v56 = vmul.f32 %v1287_v11, %v1280_v29  ;;  %v2146_v60 = vpop.f32.mrb[21].mxu1 }
 0x9f1   :  { %v1283_v35 = vpop.f32.mrb[22].mxu1 }
 0x9f2   :  { %v1289_v9 = vpack.c.bf16 %v1288_v56, %v1288_v56  ;;  %v1342_v26 = vsel %vm66_vm1, %v1288_v56, 0.0  ;;  %v2147_v33 = vpop.f32.mrb[23].mxu1 }
 0x9f3   :  { %v1343_v44 = vrot.slane %v1342_v26, 4  ;;  %v2138_v62 = vpop.f32.mrb[28].mxu0 }
 0x9f4   :  { %v1455_v5 = vmul.f32 0.1, %v2138_v62  ;;  %v1467_v63 = vmul.f32 %v2138_v62, %v2138_v62  ;;  %v1216_v38 = vpop.f32.mrb[29].mxu0  ;;  %2195 = vmatprep.subr.msk.bf16.mxu0 %vm186_vm3, %v1289_v9  ;;  %v1291_v10 = vsel %vm186_vm3, %v1289_v9, 0  ;;  %v1429_v62 = vmul.f32 0.9, %v2837_v45 }
 0x9f5   :  { %v1344_v24 = vadd.f32 %v1343_v44, %v1342_v26  ;;  %v1453_v49 = vmul.f32 0.1, %v1216_v38  ;;  %v1465_v22 = vmul.f32 %v1216_v38, %v1216_v38  ;;  %v2139_v27 = vpop.f32.mrb[30].mxu0  ;;  %2149 = vmatpush3.bf16.msra.mxu0 %v1291_v10 }
 0x9f6   :  { %v2969_v1 = vadd.f32 %v1455_v5, %v1451_v46  ;;  %v1471_v36 = vmul.f32 0.001, %v1467_v63  ;;  %v1456_v2 = vmul.f32 0.1, %v2139_v27  ;;  %v1468_v59 = vmul.f32 %v2139_v27, %v2139_v27  ;;  %v1219_v8 = vpop.f32.mrb[31].mxu0  ;;  %2154 = vmatprep.subr.bf16.mxu0 %v2455_v0 }
 0x9f7   :  { %v1345_v43 = vrot.slane %v1344_v24, 2  ;;  %v2972_v47 = vadd.f32 %v1453_v49, %v1449_v14  ;;  %v1469_v18 = vmul.f32 0.001, %v1465_v22  ;;  %v1454_v41 = vmul.f32 0.1, %v1219_v8 }
 0x9f8   :  { %v1475_v40 = vadd.f32 %v1471_v36, %v1463_v61  ;;  %v2974_v12 = vadd.f32 %v1456_v2, %v1452_v55  ;;  %v1472_v16 = vmul.f32 0.001, %v1468_v59  ;;  %2151 = vmatmul.mubr.msk.bf16.vlgmr.msra.gmra.mrb[32].mxu0 %vm179_vm2, %v2641_v53  ;;  %v1466_v35 = vmul.f32 %v1219_v8, %v1219_v8 }
 0x9f9   :  { %v1346_v30 = vadd.f32 %v1345_v43, %v1344_v24  ;;  %v1473_v11 = vadd.f32 %v1469_v18, %v1461_v34  ;;  %v2979_v29 = vadd.f32 %v1454_v41, %v1450_v48  ;;  %2158 = vmatprep.mubr.msk.bf16.mxu0 %vm2456_vm0, %v2455_v0  ;;  %v1462_v53 = vmul.f32 0.999, %v2835_v28 }
 0x9fa   :  { %v1483_v56 = vmul.f32 333.6669, %v1475_v40  ;;  %v1476_v60 = vadd.f32 %v1472_v16, %v1464_v54  ;;  %v1470_v46 = vmul.f32 0.001, %v1466_v35  ;;  %v1432_v14 = vmul.f32 0.999, %v2839_v37 }
 0x9fb   :  { %v1347_v9 = vrot.slane %v1346_v30, 1  ;;  %v1481_v26 = vmul.f32 333.6669, %v1473_v11 }
 0x9fc   :  { %2298 = vrsqrt.f32 %v1483_v56  ;;  %v1484_v52 = vmul.f32 333.6669, %v1476_v60  ;;  %v1474_v5 = vadd.f32 %v1470_v46, %v1462_v53  ;;  %vm1501_vm10 = vcmp.eq.f32.partialorder %v1483_v56, inf }
 0x9fd   :  { %v1348_v33 = vadd.f32 %v1347_v9, %v1346_v30  ;;  %2300 = vrsqrt.f32 %v1481_v26  ;;  %v1504_v27 = vand.u32 2147483648, %v1483_v56  ;;  %vm1503_vm11 = vcmp.eq.f32.partialorder %v1483_v56, 0.0 }
 0x9fe   :  { %2302 = vrsqrt.f32 %v1484_v52  ;;  %v1482_v55 = vmul.f32 333.6669, %v1474_v5  ;;  %vm1487_vm12 = vcmp.eq.f32.partialorder %v1481_v26, inf  ;;  %v1490_v45 = vand.u32 2147483648, %v1481_v26 }
 0x9ff   :  { %v1430_v61 = vmul.f32 0.1, %v1348_v33  ;;  %v1433_v44 = vmul.f32 %v1348_v33, %v1348_v33  ;;  %vm1489_vm13 = vcmp.eq.f32.partialorder %v1481_v26, 0.0  ;;  %vm1508_vm14 = vcmp.eq.f32.partialorder %v1484_v52, inf }
 0xa00   :  { %2304 = vrsqrt.f32 %v1482_v55  ;;  %v1511_v41 = vand.u32 2147483648, %v1484_v52  ;;  %vm1510_vm15 = vcmp.eq.f32.partialorder %v1484_v52, 0.0  ;;  %vm1494_vm4 = vcmp.eq.f32.partialorder %v1482_v55, inf }
 0xa01   :  { %v1434_v34 = vmul.f32 0.001, %v1433_v44  ;;  %v2986_v63 = vadd.f32 %v1430_v61, %v1429_v62  ;;  %v1497_v60 = vand.u32 2147483648, %v1482_v55  ;;  %vm1496_vm5 = vcmp.eq.f32.partialorder %v1482_v55, 0.0 }
 0xa03   :  { %v1435_v38 = vadd.f32 %v1434_v34, %v1432_v14  ;;  %v1477_v14 = vmul.f32 0.036900368, %v2972_v47  ;;  %v1436_v47 = vmul.f32 0.036900368, %v2986_v63  ;;  %v1349_v63 = vmul.f32 0.9, %v2882_v20 }
 0xa05   :  { %v1437_v10 = vmul.f32 333.6669, %v1435_v38 }
 0xa06   :  { %v2299_v24 = vpop.eup %2298 }
 0xa07   :  { %v2301_v49 = vpop.eup %2300  ;;  %2306 = vrsqrt.f32 %v1437_v10  ;;  %v1500_v22 = vmul.f32 %v2299_v24, %v1483_v56  ;;  %vm1440_vm6 = vcmp.eq.f32.partialorder %v1437_v10, inf  ;;  %v1443_v33 = vand.u32 2147483648, %v1437_v10 }
 0xa08   :  { %v1486_v28 = vmul.f32 %v2301_v49, %v1481_v26  ;;  %v2303_v37 = vpop.eup %2302  ;;  %vm1442_vm7 = vcmp.eq.f32.partialorder %v1437_v10, 0.0 }
 0xa09   :  { %v1502_v48 = vsel %vm1501_vm10, %v1483_v56, %v1500_v22  ;;  %v1507_v43 = vmul.f32 %v2303_v37, %v1484_v52 }
 0xa0a   :  { %v1505_v36 = vsel %vm1503_vm11, %v1504_v27, %v1502_v48  ;;  %v1488_v2 = vsel %vm1487_vm12, %v1481_v26, %v1486_v28  ;;  %v2305_v16 = vpop.eup %2304  ;;  %v1478_v27 = vmul.f32 0.036900368, %v2979_v29 }
 0xa0b   :  { %v1515_v59 = vadd.f32 1e-08, %v1505_v36  ;;  %v1491_v8 = vsel %vm1489_vm13, %v1490_v45, %v1488_v2  ;;  %v1509_v40 = vsel %vm1508_vm14, %v1484_v52, %v1507_v43  ;;  %v1493_v11 = vmul.f32 %v2305_v16, %v1482_v55 }
 0xa0c   :  { %v1513_v18 = vadd.f32 1e-08, %v1491_v8  ;;  %v1512_v54 = vsel %vm1510_vm15, %v1511_v41, %v1509_v40  ;;  %v1479_v52 = vmul.f32 0.036900368, %v2969_v1  ;;  %v1352_v41 = vmul.f32 0.9, %v2887_v51 }
 0xa0d   :  { %2308 = vrcp.f32 %v1515_v59  ;;  %v1516_v30 = vadd.f32 1e-08, %v1512_v54  ;;  %v1495_v35 = vsel %vm1494_vm4, %v1482_v55, %v1493_v11  ;;  %v1480_v55 = vmul.f32 0.036900368, %v2974_v12 }
 0xa0e   :  { %2310 = vrcp.f32 %v1513_v18  ;;  %v1498_v26 = vsel %vm1496_vm5, %v1497_v60, %v1495_v35  ;;  %v1361_v59 = vmul.f32 0.999, %v2890_v32  ;;  %vm1882_vm4 = vcmask 0  }
 0xa0f   :  { %2312 = vrcp.f32 %v1516_v30  ;;  %v1514_v46 = vadd.f32 1e-08, %v1498_v26  ;;  %v1350_v30 = vmul.f32 0.9, %v2892_v42 }
 0xa11   :  { %v2307_v56 = vpop.eup %2306  ;;  %2314 = vrcp.f32 %v1514_v46  ;;  %v1364_v46 = vmul.f32 0.999, %v2895_v39 }
 0xa12   :  { %v1439_v9 = vmul.f32 %v2307_v56, %v1437_v10 }
 0xa14   :  { %v1441_v61 = vsel %vm1440_vm6, %v1437_v10, %v1439_v9 }
 0xa15   :  { %v1444_v44 = vsel %vm1442_vm7, %v1443_v33, %v1441_v61 }
 0xa16   :  { %v1445_v53 = vadd.f32 1e-08, %v1444_v44 }
 0xa17   :  { %v2309_v62 = vpop.eup %2308 }
 0xa18   :  { %v2311_v34 = vpop.eup %2310  ;;  %v1522_v5 = vmul.f32 %v2309_v62, %v1479_v52  ;;  %2316 = vrcp.f32 %v1445_v53  ;;  %v1362_v52 = vmul.f32 0.999, %v2898_v7 }
 0xa19   :  { %v1518_v38 = vmul.f32 %v2311_v34, %v1477_v14  ;;  %v2313_v24 = vpop.eup %2312 }
 0xa1a   :  { %v1524_v49 = vmul.f32 %v2313_v24, %v1480_v55  ;;  %v1527_v22 = vsub.f32 %v2865_v6, %v1522_v5 }
 0xa1b   :  { %v2315_v1 = vpop.eup %2314  ;;  %v1525_v37 = vsub.f32 %v2849_v3, %v1518_v38  ;;  %v1351_v3 = vmul.f32 0.9, %v2880_v58 }
 0xa1c   :  { %v1528_v10 = vsub.f32 %v2861_v50, %v1524_v49  ;;  %v1520_v48 = vmul.f32 %v2315_v1, %v1478_v27  ;;  %v1549_v50 = vld [vmem:[#allocation2] sm:$0xff] }
 0xa1d   :  { %v3007_v6 = vpack.c.bf16 %v1549_v50, %v1549_v50 }
 0xa1e   :  { %v2994_v28 = vpack.c.bf16 %v1528_v10, %v1527_v22  ;;  %v1526_v36 = vsub.f32 %v2852_v4, %v1520_v48  ;;  %v1363_v4 = vmul.f32 0.999, %v2885_v25 }
 0xa1f   :  { %1790 = vxpose.xlu1.c.b16.start.end [1/1] (short) (narrow) %v3007_v6, 32 }
 0xa20   :  { %v3001_v2 = vpack.c.bf16 %v1526_v36, %v1525_v37 }
 0xa22   :  { %v2317_v45 = vpop.eup %2316  ;;  %2163 = vmatpush3.bf16.msra.mxu1 %v3001_v2 }
 0xa23   :  { %v2999_v12 = vmul.f32 %v2317_v45, %v1436_v47  ;;  %2164 = vmatprep.subr.bf16.mxu1 %v2455_v0 }
 0xa26   :  { %2165 = vmatpush3.bf16.msra.mxu1 %v2994_v28 }
 0xa27   :  { %2176 = vmatprep.subr.bf16.mxu1 %v2455_v0 }
 0xacb   :  { %v2152_v29 = vpop.f32.mrb[32].mxu0 }
 0xacc   :  { %v1355_v8 = vmul.f32 0.1, %v2152_v29  ;;  %v1367_v43 = vmul.f32 %v2152_v29, %v2152_v29  ;;  %v1327_v18 = vpop.f32.mrb[33].mxu0 }
 0xacd   :  { %v1353_v40 = vmul.f32 0.1, %v1327_v18  ;;  %v1365_v54 = vmul.f32 %v1327_v18, %v1327_v18  ;;  %v2153_v16 = vpop.f32.mrb[34].mxu0 }
 0xace   :  { %v1359_v11 = vadd.f32 %v1355_v8, %v1351_v3  ;;  %v1371_v56 = vmul.f32 0.001, %v1367_v43  ;;  %v1356_v58 = vmul.f32 0.1, %v2153_v16  ;;  %v1368_v60 = vmul.f32 %v2153_v16, %v2153_v16  ;;  %v1330_v25 = vpop.f32.mrb[35].mxu0 }
 0xacf   :  { %v1357_v35 = vadd.f32 %v1353_v40, %v1349_v63  ;;  %v1369_v9 = vmul.f32 0.001, %v1365_v54  ;;  %v1354_v20 = vmul.f32 0.1, %v1330_v25  ;;  %v1366_v26 = vmul.f32 %v1330_v25, %v1330_v25 }
 0xad0   :  { %v1375_v32 = vadd.f32 %v1371_v56, %v1363_v4  ;;  %v1360_v33 = vadd.f32 %v1356_v58, %v1352_v41  ;;  %v1372_v61 = vmul.f32 0.001, %v1368_v60  ;;  %v1379_v40 = vmul.f32 0.036900368, %v1359_v11 }
 0xad1   :  { %v1373_v51 = vadd.f32 %v1369_v9, %v1361_v59  ;;  %v1358_v44 = vadd.f32 %v1354_v20, %v1350_v30  ;;  %v1370_v53 = vmul.f32 0.001, %v1366_v26  ;;  %v1377_v16 = vmul.f32 0.036900368, %v1357_v35 }
 0xad2   :  { %v1383_v42 = vmul.f32 333.6669, %v1375_v32  ;;  %v1376_v62 = vadd.f32 %v1372_v61, %v1364_v46  ;;  %v1380_v60 = vmul.f32 0.036900368, %v1360_v33  ;;  %v1448_v35 = vsub.f32 %v2927_v23, %v2999_v12 }
 0xad3   :  { %v1381_v14 = vmul.f32 333.6669, %v1373_v51  ;;  %v1374_v34 = vadd.f32 %v1370_v53, %v1362_v52  ;;  %v1378_v9 = vmul.f32 0.036900368, %v1358_v44  ;;  %v1744_v23 = vsel %vm179_vm2, %v2994_v28, 0 }
 0xad4   :  { %2318 = vrsqrt.f32 %v1383_v42  ;;  %v1384_v5 = vmul.f32 333.6669, %v1376_v62  ;;  %vm1401_vm8 = vcmp.eq.f32.partialorder %v1383_v42, inf  ;;  %v1404_v39 = vand.u32 2147483648, %v1383_v42 }
 0xad5   :  { %2320 = vrsqrt.f32 %v1381_v14  ;;  %v1382_v38 = vmul.f32 333.6669, %v1374_v34  ;;  %vm1403_vm9 = vcmp.eq.f32.partialorder %v1383_v42, 0.0  ;;  %vm1387_vm10 = vcmp.eq.f32.partialorder %v1381_v14, inf }
 0xad6   :  { %2322 = vrsqrt.f32 %v1384_v5  ;;  %v1390_v7 = vand.u32 2147483648, %v1381_v14  ;;  %vm1389_vm11 = vcmp.eq.f32.partialorder %v1381_v14, 0.0  ;;  %vm1408_vm12 = vcmp.eq.f32.partialorder %v1384_v5, inf }
 0xad7   :  { %2324 = vrsqrt.f32 %v1382_v38  ;;  %vm1410_vm13 = vcmp.eq.f32.partialorder %v1384_v5, 0.0  ;;  %v1411_v3 = vand.u32 2147483648, %v1384_v5  ;;  %vm1394_vm14 = vcmp.eq.f32.partialorder %v1382_v38, inf }
 0xad8   :  { %v1397_v63 = vand.u32 2147483648, %v1382_v38  ;;  %vm1396_vm15 = vcmp.eq.f32.partialorder %v1382_v38, 0.0 }
 0xade   :  { %v2319_v55 = vpop.eup %2318 }
 0xadf   :  { %v2321_v24 = vpop.eup %2320  ;;  %v1400_v49 = vmul.f32 %v2319_v55, %v1383_v42 }
 0xae0   :  { %v1386_v22 = vmul.f32 %v2321_v24, %v1381_v14  ;;  %v2323_v27 = vpop.eup %2322 }
 0xae1   :  { %v1402_v10 = vsel %vm1401_vm8, %v1383_v42, %v1400_v49  ;;  %v2325_v47 = vpop.eup %2324  ;;  %v1407_v36 = vmul.f32 %v2323_v27, %v1384_v5 }
 0xae2   :  { %v1405_v1 = vsel %vm1403_vm9, %v1404_v39, %v1402_v10  ;;  %v1388_v48 = vsel %vm1387_vm10, %v1381_v14, %v1386_v22  ;;  %v1393_v4 = vmul.f32 %v2325_v47, %v1382_v38  ;;  %v1741_v14 = vsel %vm179_vm2, %v3001_v2, 0  ;;  %v1798_v47 = vpop.trf.xlu1 }
 0xae3   :  { %v1415_v45 = vadd.f32 1e-08, %v1405_v1  ;;  %v1391_v37 = vsel %vm1389_vm11, %v1390_v7, %v1388_v48  ;;  %v1409_v29 = vsel %vm1408_vm12, %v1384_v5, %v1407_v36 }
 0xae4   :  { %v1413_v50 = vadd.f32 1e-08, %v1391_v37  ;;  %v1412_v59 = vsel %vm1410_vm13, %v1411_v3, %v1409_v29  ;;  %v1395_v8 = vsel %vm1394_vm14, %v1382_v38, %v1393_v4 }
 0xae5   :  { %2326 = vrcp.f32 %v1415_v45  ;;  %v1416_v43 = vadd.f32 1e-08, %v1412_v59  ;;  %v1398_v18 = vsel %vm1396_vm15, %v1397_v63, %v1395_v8 }
 0xae6   :  { %2328 = vrcp.f32 %v1413_v50  ;;  %v1414_v41 = vadd.f32 1e-08, %v1398_v18 }
 0xae7   :  { %2330 = vrcp.f32 %v1416_v43 }
 0xae8   :  { %2332 = vrcp.f32 %v1414_v41 }
 0xaef   :  { %v2327_v54 = vpop.eup %2326 }
 0xaf0   :  { %v2329_v30 = vpop.eup %2328  ;;  %v1422_v56 = vmul.f32 %v2327_v54, %v1379_v40 }
 0xaf1   :  { %v1418_v58 = vmul.f32 %v2329_v30, %v1377_v16  ;;  %v2331_v25 = vpop.eup %2330 }
 0xaf2   :  { %v2333_v20 = vpop.eup %2332  ;;  %v1424_v26 = vmul.f32 %v2331_v25, %v1380_v60  ;;  %v1427_v46 = vsub.f32 %v2918_v19, %v1422_v56  ;;  %v1559_v19 = vrot.slane %v1448_v35, %v2594_v17 }
 0xaf3   :  { %v1420_v32 = vmul.f32 %v2333_v20, %v1378_v9  ;;  %v1425_v51 = vsub.f32 %v2907_v15, %v1418_v58  ;;  %v1799_v20 = vpop.trf.xlu1 }
 0xaf4   :  { %v1428_v61 = vsub.f32 %v2915_v21, %v1424_v26 }
 0xaf5   :  { %v1426_v52 = vsub.f32 %v2910_v13, %v1420_v32 }
 0xaf6   :  { %v1552_v11 = vpack.c.bf16 %v1428_v61, %v1427_v46 }
 0xaf7   :  { %v1551_v53 = vpack.c.bf16 %v1426_v52, %v1425_v51 }
 0xaf9   :  { %2155 = vmatpush3.bf16.msra.mxu0 %v1551_v53 }
 0xafa   :  { %2156 = vmatprep.subr.bf16.mxu0 %v2455_v0 }
 0xafd   :  { %2157 = vmatpush3.bf16.msra.mxu0 %v1552_v11 }
 0xb00   :  { %2159 = vmatmul.mubr.msk.bf16.vlgmr.msra.gmra.mrb[36].mxu0 %vm66_vm1, %v3007_v6  ;;  %v1548_v6 = vsub.f32 %v2943_v31, %v2958_v57 }
 0xb02   :  { %v1610_v34 = vrot.slane %v1548_v6, %v2594_v17 }
 0xbd3   :  { %v1598_v33 = vpop.f32.mrb[36].mxu0 }
 0xbd4   :  { %v1599_v21 = vadd.f32 %v1598_v33, %v1559_v19  ;;  %v2160_v44 = vpop.f32.mrb[37].mxu0 }
 0xbd5   :  { %v1601_v15 = vpop.f32.mrb[38].mxu0 }
 0xbd6   :  { %2334 = vtanh.f32 %v1599_v21  ;;  %v2161_v13 = vpop.f32.mrb[39].mxu0 }
 0xbe0   :  { %v2335_v42 = vpop.eup %2334 }
 0xbe1   :  { %v1605_v62 = vpack.c.bf16 %v2335_v42, %v2335_v42  ;;  %v1786_v59 = vmul.f32 %v2335_v42, %v2335_v42 }
 0xbe3   :  { %1657 = vxpose.xlu0.c.b16.start.end [1/1] (short) (narrow) %v1605_v62, 32  ;;  %2167 = vmatmul.mubr.msk.bf16.vlgmr.msra.gmra.mrb[24].mxu1 %vm66_vm1, %v1605_v62  ;;  %v1787_v8 = vsub.f32 1.0, %v1786_v59 }
 0xbe4   :  { %2177 = vmatpush3.bf16.xpose.msra.mxu1 %v1741_v14  ;;  %2180 = vmatprep.mubr.msk.bf16.mxu1 %vm2456_vm0, %v2455_v0  ;;  %vm1894_vm0 = vcmask 57344  }
 0xbe5   :  { %2178 = vmatprep.subr.bf16.mxu1 %v2455_v0 }
 0xbec   :  { %2179 = vmatpush3.bf16.xpose.msra.mxu1 %v1744_v23 }
 0xc49   :  { %v1665_v12 = vpop.trf.xlu0 }
 0xc4a   :  { %2172 = vmatprep.mubr.msk.bf16.mxu0 %vm179_vm2, %v1665_v12 }
 0xc4d   :  { %v1666_v7 = vpop.trf.xlu0 }
 0xcb6   :  { %v1649_v5 = vpop.f32.mrb[24].mxu1 }
 0xcb7   :  { %v1650_v2 = vadd.f32 %v1649_v5, %v1610_v34  ;;  %v2168_v38 = vpop.f32.mrb[25].mxu1 }
 0xcb8   :  { %v1652_v55 = vpop.f32.mrb[26].mxu1 }
 0xcb9   :  { %v1655_v24 = vmul.f32 0.03125, %v1650_v2  ;;  %v2169_v49 = vpop.f32.mrb[27].mxu1  ;;  %v1871_v39 = vmul.f32 %v1650_v2, %v1650_v2 }
 0xcbb   :  { %v1656_v0 = vpack.c.bf16 %v1655_v24, %v1655_v24  ;;  %v1731_v22 = vsel %vm179_vm2, %v1655_v24, 0.0  ;;  %v1872_v28 = vsel %vm179_vm2, %v1871_v39, 0.0 }
 0xcbc   :  { %v1732_v10 = vrot.slane %v1731_v22, 4  ;;  %1873 = vadd.xlane.f32.xlu0 %v1872_v28 }
 0xcbd   :  { %2196 = vmatprep.subr.msk.bf16.mxu0 %vm186_vm3, %v1656_v0  ;;  %2181 = vmatmul.mubr.msk.bf16.vlgmr.msra.gmra.mrb[28].mxu1 %vm179_vm2, %v1656_v0  ;;  %v1680_v17 = vsel %vm186_vm3, %v1656_v0, 0 }
 0xcbe   :  { %v1733_v31 = vadd.f32 %v1732_v10, %v1731_v22  ;;  %2171 = vmatpush3.bf16.msra.mxu0 %v1680_v17 }
 0xcc0   :  { %v1734_v57 = vrot.slane %v1733_v31, 2 }
 0xcc1   :  { %2173 = vmatmul.mubr.msk.bf16.vlgmr.msra.gmra.mrb[40].mxu0 %vm179_vm2, %v1666_v7 }
 0xcc2   :  { %v1735_v27 = vadd.f32 %v1734_v57, %v1733_v31  ;;  %2186 = vmatprep.mubr.msk.bf16.mxu0 %vm179_vm2, %v1798_v47 }
 0xcc4   :  { %v1736_v1 = vrot.slane %v1735_v27, 1 }
 0xcc6   :  { %v1737_v48 = vadd.f32 %v1736_v1, %v1735_v27 }
 0xcc8   :  { %1895 = vst.msk [vmem:[#allocation9] sm:$0x1] %vm1894_vm0, %v1737_v48 }
 0xd49   :  { %v1874_v45 = vpop.xlane.xlu0 %1873 }
 0xd4a   :  { %v1875_v37 = vrot.slane %v1874_v45, 4 }
 0xd4c   :  { %v1876_v36 = vadd.f32 %v1875_v37, %v1874_v45 }
 0xd4e   :  { %v1877_v50 = vrot.slane %v1876_v36, 2 }
 0xd50   :  { %v1878_v3 = vadd.f32 %v1877_v50, %v1876_v36 }
 0xd52   :  { %v1879_v4 = vrot.slane %v1878_v3, 1 }
 0xd54   :  { %v1880_v29 = vadd.f32 %v1879_v4, %v1878_v3 }
 0xd56   :  { %v1881_v63 = vmul.f32 0.015625, %v1880_v29 }
 0xd58   :  { %1883 = vst.msk [vmem:[#allocation5] sm:$0x1] %vm1882_vm4, %v1881_v63 }
 0xd90   :  { %v1780_v43 = vpop.f32.mrb[28].mxu1 }
 0xd91   :  { %v1788_v18 = vmul.f32 %v1787_v8, %v1780_v43  ;;  %v2182_v41 = vpop.f32.mrb[29].mxu1 }
 0xd92   :  { %v1783_v40 = vpop.f32.mrb[30].mxu1 }
 0xd93   :  { %v1789_v54 = vpack.c.bf16 %v1788_v18, %v1788_v18  ;;  %v1864_v16 = vsel %vm66_vm1, %v1788_v18, 0.0  ;;  %v2183_v30 = vpop.f32.mrb[31].mxu1 }
 0xd94   :  { %v1865_v56 = vrot.slane %v1864_v16, 4  ;;  %v2174_v58 = vpop.f32.mrb[40].mxu0 }
 0xd95   :  { %2197 = vmatprep.subr.msk.bf16.mxu0 %vm186_vm3, %v1789_v54  ;;  %v1813_v60 = vsel %vm186_vm3, %v1789_v54, 0  ;;  %1892 = vst.msk [vmem:[%s3136_s9 + $0x10] sm:$0xff] %vm179_vm2, %v2174_v58  ;;  %v1716_v25 = vpop.f32.mrb[41].mxu0  ;;  %vm1888_vm3 = vcmask 253952  }
 0xd96   :  { %v1866_v9 = vadd.f32 %v1865_v56, %v1864_v16  ;;  %2185 = vmatpush3.bf16.msra.mxu0 %v1813_v60  ;;  %1890 = vst.msk [vmem:[%s3136_s9] sm:$0xff] %vm179_vm2, %v1716_v25  ;;  %v2175_v26 = vpop.f32.mrb[42].mxu0 }
 0xd97   :  { %1893 = vst.msk [vmem:[%s3136_s9 + $0x18] sm:$0xff] %vm179_vm2, %v2175_v26  ;;  %v1719_v32 = vpop.f32.mrb[43].mxu0 }
 0xd98   :  { %v1867_v46 = vrot.slane %v1866_v9, 2  ;;  %1891 = vst.msk [vmem:[%s3136_s9 + $0x8] sm:$0xff] %vm179_vm2, %v1719_v32 }
 0xd99   :  { %2187 = vmatmul.mubr.msk.bf16.vlgmr.msra.gmra.mrb[44].mxu0 %vm179_vm2, %v1799_v20 }
 0xd9a   :  { %v1868_v61 = vadd.f32 %v1867_v46, %v1866_v9 }
 0xd9c   :  { %v1869_v51 = vrot.slane %v1868_v61, 1 }
 0xd9e   :  { %v1870_v52 = vadd.f32 %v1869_v51, %v1868_v61 }
 0xda0   :  { %1889 = vst.msk [vmem:[#allocation8] sm:$0x1] %vm1888_vm3, %v1870_v52 }
 0xda1   :  { %2369 = shalt.err (!%p2366_p12)
}
 0xda2   :  { %s2370_s13 = scalar_lea.hbm %s3133_s6, 16 }
 0xda3   :  { %p2371_p13 = scmp.ne.s32.totalorder %s3133_s6, %s2370_s13  ;;  %p2374_p0 = scmp.lt.u32.totalorder %s2370_s13, %s3133_s6 }
 0xda5   :  { %p2376_p1 = pnand %p2374_p0, %p2371_p13 }
 0xda7   :  { %2379 = shalt.err (!%p2376_p1)
}
 0xda8   :  { %1905 = dma.vmem_to_hbm [thread:$0]  %s1903_s29, 16, %s3133_s6, [#allocation4]  }
 0xda9   :  { %s2458_s18 = smov [#allocation9]  }
 0xdaa   :  { %s1936_s19 = sshll.u32 %s2458_s18, 4  ;;  %s1937_s19 = int_to_ptr.vmem [resolvable:$true] %s1936_s19 }
 0xdab   :  { %s2380_s20 = scalar_lea.vmem %s1937_s19, 16  ;;  %s2384_s21 = scalar_lea.vmem %s1937_s19, 32 }
 0xdac   :  { %p2381_p2 = scmp.ne.s32.totalorder %s1937_s19, %s2380_s20  ;;  %p2385_p3 = scmp.lt.s32.totalorder %s1937_s19, %s1937_s19 }
 0xdad   :  { %p2386_p4 = scmp.lt.s32.totalorder %s2384_s21, %s2380_s20 }
 0xdaf   :  { %p2387_p5 = por %p2386_p4, %p2385_p3 }
 0xdb1   :  { %p2388_p6 = pnand %p2387_p5, %p2381_p2 }
 0xdb3   :  { %2391 = shalt.err (!%p2388_p6)
}
 0xdb4   :  { %s2392_s5 = scalar_lea.hbm %s3137_s10, 16 }
 0xdb5   :  { %p2393_p7 = scmp.ne.s32.totalorder %s3137_s10, %s2392_s5  ;;  %p2396_p8 = scmp.lt.u32.totalorder %s2392_s5, %s3137_s10 }
 0xdb7   :  { %p2398_p9 = pnand %p2396_p8, %p2393_p7 }
 0xdb9   :  { %2401 = shalt.err (!%p2398_p9)
}
 0xdba   :  { %1939 = dma.vmem_to_hbm [thread:$0]  %s1937_s19, 16, %s3137_s10, [#allocation10]  }
 0xdbb   :  { %s2459_s1 = smov [#allocation6]   ;;  %s2460_s28 = smov [#allocation8]  }
 0xdbc   :  { %s1911_s27 = sshll.u32 %s2459_s1, 4  ;;  %s1924_s29 = sshll.u32 %s2460_s28, 4  ;;  %s1912_s27 = int_to_ptr.vmem [resolvable:$true] %s1911_s27  ;;  %s3094_s29 = int_to_ptr.vmem [resolvable:$true] %s1924_s29 }
 0xdbd   :  { %s2402_s10 = scalar_lea.vmem %s1912_s27, 512  ;;  %p2407_p11 = scmp.lt.s32.totalorder %s1912_s27, %s1912_s27 }
 0xdbe   :  { %p2403_p10 = scmp.ne.s32.totalorder %s1912_s27, %s2402_s10  ;;  %p2408_p12 = scmp.lt.s32.totalorder %s2402_s10, %s2402_s10 }
 0xdc0   :  { %p2409_p13 = por %p2408_p12, %p2407_p11 }
 0xdc2   :  { %p2410_p0 = pnand %p2409_p13, %p2403_p10 }
 0xe6c   :  { %v2188_v11 = vpop.f32.mrb[44].mxu0 }
 0xe6d   :  { %1886 = vst.msk [vmem:[#allocation6 + $0x10] sm:$0xff] %vm66_vm1, %v2188_v11  ;;  %v1849_v53 = vpop.f32.mrb[45].mxu0 }
 0xe6e   :  { %1884 = vst.msk [vmem:[#allocation6] sm:$0xff] %vm66_vm1, %v1849_v53  ;;  %v2189_v35 = vpop.f32.mrb[46].mxu0 }
 0xe6f   :  { %1887 = vst.msk [vmem:[#allocation6 + $0x18] sm:$0xff] %vm66_vm1, %v2189_v35  ;;  %v1852_v19 = vpop.f32.mrb[47].mxu0 }
 0xe70   :  { %1885 = vst.msk [vmem:[#allocation6 + $0x8] sm:$0xff] %vm66_vm1, %v1852_v19 }
 0xe71   :  { %2413 = shalt.err (!%p2410_p0)
}
 0xe72   :  { %s2414_s12 = scalar_lea.hbm %s3134_s7, 512 }
 0xe73   :  { %p2415_p1 = scmp.ne.s32.totalorder %s3134_s7, %s2414_s12  ;;  %p2418_p2 = scmp.lt.u32.totalorder %s2414_s12, %s3134_s7 }
 0xe75   :  { %p2420_p3 = pnand %p2418_p2, %p2415_p1 }
 0xe77   :  { %2423 = shalt.err (!%p2420_p3)
}
 0xe78   :  { %s2461_s15 = smov 128   ;;  %s2462_s16 = smov 8  }
 0xe79   :  { %1917 = dma.vmem_to_hbm [thread:$0]  %s1912_s27, 512, %s3134_s7, [#allocation7], %s2461_s15, %s2461_s15, %s2462_s16  }
 0xe7a   :  { %s2424_s18 = scalar_lea.vmem %s3094_s29, 16  ;;  %s2428_s19 = scalar_lea.vmem %s3094_s29, 32 }
 0xe7b   :  { %p2425_p4 = scmp.ne.s32.totalorder %s3094_s29, %s2424_s18  ;;  %p2429_p5 = scmp.lt.s32.totalorder %s3094_s29, %s3094_s29 }
 0xe7c   :  { %p2430_p6 = scmp.lt.s32.totalorder %s2428_s19, %s2424_s18 }
 0xe7e   :  { %p2431_p7 = por %p2430_p6, %p2429_p5 }
 0xe80   :  { %p2432_p8 = pnand %p2431_p7, %p2425_p4 }
 0xe82   :  { %2435 = shalt.err (!%p2432_p8)
}
 0xe83   :  { %s2436_s3 = scalar_lea.hbm %s3135_s8, 16 }
 0xe84   :  { %p2437_p9 = scmp.ne.s32.totalorder %s3135_s8, %s2436_s3  ;;  %p2440_p10 = scmp.lt.u32.totalorder %s2436_s3, %s3135_s8 }
 0xe86   :  { %p2442_p11 = pnand %p2440_p10, %p2437_p9 }
 0xe88   :  { %2445 = shalt.err (!%p2442_p11)
}
 0xe89   :  { %1927 = dma.vmem_to_hbm [thread:$0]  %s3094_s29, 16, %s3135_s8, [#allocation7]  }
 0xe8a   :  { %2448 = dma.done.wait [#allocation4], 16  }
 0xe8b   :  { %2449 = vsyncadd [#allocation4], 4294967280 }
 0xe8c   :  { %2450 = dma.done.wait [#allocation7], 528  }
 0xe8d   :  { %2451 = vsyncadd [#allocation7], 4294966768 }
 0xe8e   :  { %2452 = dma.done.wait [#allocation10], 16  }
 0xe8f   :  { %2453 = vsyncadd [#allocation10], 4294967280 }
 0xe90   :  { %1954 = vsyncpa [#allocation3], 1 }
 0xe91   :  { %1955 = vsyncpa [#allocation4], 1 }
 0xe92   :  { %1956 = vsyncpa [#allocation7], 1 }
 0xe93   :  { %1957 = vsyncpa [#allocation10], 1 }

</bundles_post_ra>
